<compile_context>
chip_gen: v6e
topology: v6e:2x2x1
jax: 0.10.0
libtpu: 0.0.40
codegen_flags: <defaults>
</compile_context>

<pallas_src>
import functools
import math

import jax
import jax.numpy as jnp
from jax.experimental import pallas as pl
from jax.experimental.pallas import tpu as pltpu

LN_EPS = 1e-5                     # nn.LayerNorm default
MATMUL_DTYPE = jnp.bfloat16       # MXU-native operand dtype; accumulation stays f32


# ----------------------------------------------------------------------------
# In-kernel helpers (operate on VMEM-resident values; operands already bf16)
# ----------------------------------------------------------------------------
def _mm(a, b):
    """a @ b on the MXU with f32 accumulation (operands pre-cast to bf16)."""
    return jnp.dot(a, b, preferred_element_type=jnp.float32)


def _mm_t(a, b):
    """a @ b.T without materializing the transpose (contract dim 1 with dim 1)."""
    return jax.lax.dot_general(
        a, b, (((1,), (1,)), ((), ())), preferred_element_type=jnp.float32)


def _layernorm(y, g, b):
    mu = jnp.mean(y, axis=-1, keepdims=True)
    var = jnp.mean((y - mu) ** 2, axis=-1, keepdims=True)
    return (y - mu) * jax.lax.rsqrt(var + LN_EPS) * g + b


def _mha_block(x_f32, x_bf, wqkv, wo, bo, g, b, concat_ref, attn_ref,
               *, n_head, d_k, d_v):
    """Self-attention MHA on one batch element's (L, Dm) tile.

    q = k = v = residual = x.  wqkv is head-fused (Dm, H*(2*Dk+Dv)) bf16,
    wo is (H*Dv, Dm) bf16.  Head outputs are slice-written into the shared
    (L, H*Dv) bf16 VMEM scratch `concat_ref`.  If attn_ref is given, per-head
    attention maps are written to attn_ref[h, 0] (block (H, 1, L, L))."""
    scale = 1.0 / math.sqrt(d_k)
    hdk = n_head * d_k

    # ONE fused projection matmul for Q, K and V of ALL heads.
    qkv = _mm(x_bf, wqkv)                                 # (L, 2*H*Dk + H*Dv) f32
    # Hoisted bf16 casts (done once, not per head); QK^T scale folded into q.
    q_all = (qkv[:, :hdk] * scale).astype(MATMUL_DTYPE)
    k_all = qkv[:, hdk:2 * hdk].astype(MATMUL_DTYPE)
    v_all = qkv[:, 2 * hdk:].astype(MATMUL_DTYPE)

    for h in range(n_head):                               # static unrolled loop
        q = q_all[:, h * d_k:(h + 1) * d_k]
        k = k_all[:, h * d_k:(h + 1) * d_k]
        v = v_all[:, h * d_v:(h + 1) * d_v]
        s = _mm_t(q, k)                                   # (L, L) f32, pre-scaled
        s = s - jnp.max(s, axis=-1, keepdims=True)
        p = jnp.exp(s)
        # EUP reciprocal instead of a VALU divide.
        attn = p * pl.reciprocal(jnp.sum(p, axis=-1, keepdims=True), approx=True)
        if attn_ref is not None:
            attn_ref[h, 0] = attn.astype(attn_ref.dtype)
        # Slice-write head output into the shared bf16 concat scratch.
        concat_ref[:, h * d_v:(h + 1) * d_v] = (
            _mm(attn.astype(MATMUL_DTYPE), v).astype(MATMUL_DTYPE))

    y = _mm(concat_ref[...], wo) + bo                     # output projection
    return _layernorm(y + x_f32, g, b)                    # residual + LayerNorm


# ----------------------------------------------------------------------------
# Fused whole-layer kernel (one grid step per batch element)
# ----------------------------------------------------------------------------
def _encoder_layer_kernel(
        x_ref,
        lqkv_ref, lwo_ref, lbo_ref, lg_ref, lb_ref,
        sqkv_ref, swo_ref, sbo_ref, sg_ref, sb_ref,
        w1_ref, b1_ref, w2_ref, b2_ref, fg_ref, fb_ref,
        out_ref, attn_ref,
        concat_ref,
        *, n_head_local, d_k_local, d_v_local, n_head, d_k, d_v):
    x = x_ref[0]                                          # (L, Dm), f32
    x_bf = x.astype(MATMUL_DTYPE)                         # cast once

    # --- local MHA: its attention map is discarded by the module, so it is
    # never materialized / written to HBM.
    local_out = _mha_block(
        x, x_bf, lqkv_ref[...], lwo_ref[...], lbo_ref[...],
        lg_ref[...], lb_ref[...], concat_ref, None,
        n_head=n_head_local, d_k=d_k_local, d_v=d_v_local)

    # --- self MHA (local_type='qkv': q = k = v = residual = local_out).
    local_bf = local_out.astype(MATMUL_DTYPE)             # cast once
    enc = _mha_block(
        local_out, local_bf, sqkv_ref[...], swo_ref[...], sbo_ref[...],
        sg_ref[...], sb_ref[...], concat_ref, attn_ref,
        n_head=n_head, d_k=d_k, d_v=d_v)

    # --- Position-wise FFN (1x1 convs == per-position matmuls) + residual + LN.
    enc_bf = enc.astype(MATMUL_DTYPE)                     # cast once
    hid = jnp.maximum(_mm(enc_bf, w1_ref[...]) + b1_ref[...], 0.0)
    y = _mm(hid.astype(MATMUL_DTYPE), w2_ref[...]) + b2_ref[...]
    out_ref[0] = _layernorm(y + enc, fg_ref[...], fb_ref[...]).astype(out_ref.dtype)


# ----------------------------------------------------------------------------
# Wrapper
# ----------------------------------------------------------------------------
def pack_layer_params(params):
    """Pack f32 params into the kernel layout: fused (Dm, H*(2Dk+Dv)) bf16 QKV
    weights, bf16 projection/FFN weights, f32 biases & LayerNorm params.
    Call once outside jit so weights live in HBM in bf16."""
    def pack_mha(p):
        return {
            "wqkv": jnp.concatenate([p["wq"], p["wk"], p["wv"]], axis=1
                                    ).astype(MATMUL_DTYPE),
            "wo": p["w_proj"].astype(MATMUL_DTYPE),
            "bo": p["b_proj"], "ln_g": p["ln_g"], "ln_b": p["ln_b"],
        }
    fp = params["pos_ffn"]
    return {
        "local_attn": pack_mha(params["local_attn"]),
        "slf_attn": pack_mha(params["slf_attn"]),
        "pos_ffn": {
            "w1": fp["w1"].astype(MATMUL_DTYPE), "b1": fp["b1"],
            "w2": fp["w2"].astype(MATMUL_DTYPE), "b2": fp["b2"],
            "ln_g": fp["ln_g"], "ln_b": fp["ln_b"],
        },
    }


def make_local_encoder_layer(d_model, d_inner, n_head, d_k, d_v,
                             attn_dtype=jnp.float32):
    """Returns forward(enc_input, packed_params) for local_type='qkv', no masks."""
    assert n_head % 4 == 0, "local MHA uses n_head // 4 heads"
    n_head_local, d_k_local, d_v_local = n_head // 4, d_k * 4, d_v * 4
    # (n_head//4)*(d_v*4) == n_head*d_v, so both stages share one concat scratch.
    assert n_head_local * d_v_local == n_head * d_v

    def forward(enc_input, params):
        B, L, Dm = enc_input.shape
        assert L % 8 == 0, "L should be a multiple of 8 (f32 sublane) for clean tiling"
        lp, sp, fp = params["local_attn"], params["slf_attn"], params["pos_ffn"]

        def rep(t):   # replicated (broadcast), single-buffered weight/bias spec
            shape = t.shape
            return pl.BlockSpec(shape, lambda b, _n=len(shape): (0,) * _n,
                                pipeline_mode=pl.Buffered(buffer_count=1))

        kernel = functools.partial(
            _encoder_layer_kernel,
            n_head_local=n_head_local, d_k_local=d_k_local, d_v_local=d_v_local,
            n_head=n_head, d_k=d_k, d_v=d_v)

        enc_out, attn = pl.pallas_call(
            kernel,
            out_shape=(
                jax.ShapeDtypeStruct((B, L, Dm), jnp.float32),
                jax.ShapeDtypeStruct((n_head, B, L, L), attn_dtype),
            ),
            grid=(B,),
            in_specs=[
                pl.BlockSpec((1, L, Dm), lambda b: (b, 0, 0)),   # x (fetched once)
                # local MHA params (fused QKV bf16, proj bf16, f32 bias/LN)
                rep(lp["wqkv"]), rep(lp["wo"]), rep(lp["bo"]),
                rep(lp["ln_g"]), rep(lp["ln_b"]),
                # self MHA params
                rep(sp["wqkv"]), rep(sp["wo"]), rep(sp["bo"]),
                rep(sp["ln_g"]), rep(sp["ln_b"]),
                # FFN params
                rep(fp["w1"]), rep(fp["b1"]), rep(fp["w2"]), rep(fp["b2"]),
                rep(fp["ln_g"]), rep(fp["ln_b"]),
            ],
            out_specs=(
                pl.BlockSpec((1, L, Dm), lambda b: (b, 0, 0)),
                pl.BlockSpec((n_head, 1, L, L), lambda b: (0, b, 0, 0)),
            ),
            scratch_shapes=[
                # shared head-concat buffer, bf16, consumed by the wo matmul
                pltpu.VMEM((L, n_head * d_v), MATMUL_DTYPE),
            ],
            compiler_params=pltpu.CompilerParams(
                dimension_semantics=("parallel",),   # v7x: 2 TCs split the batch
                vmem_limit_bytes=48 * 1024 * 1024),
        )(enc_input,
          lp["wqkv"], lp["wo"], lp["bo"], lp["ln_g"], lp["ln_b"],
          sp["wqkv"], sp["wo"], sp["bo"], sp["ln_g"], sp["ln_b"],
          fp["w1"], fp["b1"], fp["w2"], fp["b2"], fp["ln_g"], fp["ln_b"])
        return enc_out, attn
        # TODO(synk): local_type in {'qv','kv','diff'} (cross-attention inputs)
        # and attn_mask / attn_pos_emb paths are not exercised here; dropout is
        # identity (eval mode).

    return forward


# ----------------------------------------------------------------------------
# Deterministic parameter init (xavier-normal-ish), head-fused weight layout
# ----------------------------------------------------------------------------
def _xavier(key, fan_in, fan_out, shape):
    std = math.sqrt(2.0 / (fan_in + fan_out))
    return jax.random.normal(key, shape, dtype=jnp.float32) * std


def init_mha_params(key, n_head, d_model, d_k, d_v):
    ks = jax.random.split(key, 4)
    return {
        # head-fused: columns [h*d_k:(h+1)*d_k] belong to head h
        "wq": _xavier(ks[0], d_model, d_k, (d_model, n_head * d_k)),
        "wk": _xavier(ks[1], d_model, d_k, (d_model, n_head * d_k)),
        "wv": _xavier(ks[2], d_model, d_v, (d_model, n_head * d_v)),
        "w_proj": _xavier(ks[3], n_head * d_v, d_model, (n_head * d_v, d_model)),
        "b_proj": jnp.zeros((1, d_model), jnp.float32),
        "ln_g": jnp.ones((1, d_model), jnp.float32),
        "ln_b": jnp.zeros((1, d_model), jnp.float32),
    }


def init_ffn_params(key, d_model, d_inner):
    ks = jax.random.split(key, 2)
    # Conv1d(d_model, d_inner, 1).weight is (d_inner, d_model, 1); stored as its
    # squeezed transpose so the kernel does x @ w1.
    return {
        "w1": _xavier(ks[0], d_model, d_inner, (d_model, d_inner)),
        "b1": jnp.zeros((1, d_inner), jnp.float32),
        "w2": _xavier(ks[1], d_inner, d_model, (d_inner, d_model)),
        "b2": jnp.zeros((1, d_model), jnp.float32),
        "ln_g": jnp.ones((1, d_model), jnp.float32),
        "ln_b": jnp.zeros((1, d_model), jnp.float32),
    }


def init_layer_params(key, d_model, d_inner, n_head, d_k, d_v):
    k0, k1, k2 = jax.random.split(key, 3)
    return {
        "local_attn": init_mha_params(k0, n_head // 4, d_model, d_k * 4, d_v * 4),
        "slf_attn": init_mha_params(k1, n_head, d_model, d_k, d_v),
        "pos_ffn": init_ffn_params(k2, d_model, d_inner),
    }


# ----------------------------------------------------------------------------
# Pure-JAX reference (correctness sanity check, Precision.HIGHEST f32)
# ----------------------------------------------------------------------------
def _ln_ref(x, g, b):
    mu = jnp.mean(x, -1, keepdims=True)
    var = jnp.mean((x - mu) ** 2, -1, keepdims=True)
    return (x - mu) * jax.lax.rsqrt(var + LN_EPS) * g + b


def _mha_ref(q_in, k_in, v_in, p, H, Dk, Dv):
    hp = jax.lax.Precision.HIGHEST
    B, L, Dm = q_in.shape
    wq = p["wq"].reshape(Dm, H, Dk)
    wk = p["wk"].reshape(Dm, H, Dk)
    wv = p["wv"].reshape(Dm, H, Dv)
    q = jnp.einsum("bld,dhk->hblk", q_in, wq, precision=hp)
    k = jnp.einsum("bld,dhk->hblk", k_in, wk, precision=hp)
    v = jnp.einsum("bld,dhk->hblk", v_in, wv, precision=hp)
    s = jnp.einsum("hbqk,hbmk->hbqm", q, k, precision=hp) / math.sqrt(Dk)
    attn = jax.nn.softmax(s, axis=-1)
    o = jnp.einsum("hbqm,hbmv->hbqv", attn, v, precision=hp)
    concat = jnp.transpose(o, (1, 2, 0, 3)).reshape(B, L, H * Dv)
    y = jnp.einsum("blh,hd->bld", concat, p["w_proj"], precision=hp) + p["b_proj"][0]
    return _ln_ref(y + q_in, p["ln_g"][0], p["ln_b"][0]), attn


def _ffn_ref(x, p):
    hp = jax.lax.Precision.HIGHEST
    h = jax.nn.relu(jnp.einsum("bld,dh->blh", x, p["w1"], precision=hp) + p["b1"][0])
    y = jnp.einsum("blh,hd->bld", h, p["w2"], precision=hp) + p["b2"][0]
    return _ln_ref(y + x, p["ln_g"][0], p["ln_b"][0])


def _layer_ref(x, params, n_head, d_k, d_v):
    lo, _ = _mha_ref(x, x, x, params["local_attn"],
                     n_head // 4, d_k * 4, d_v * 4)
    eo, attn = _mha_ref(lo, lo, lo, params["slf_attn"], n_head, d_k, d_v)
    return _ffn_ref(eo, params["pos_ffn"]), attn


# ----------------------------------------------------------------------------
if __name__ == "__main__":
    # Small config consistent with the module's __init__.
    B, L = 2, 8
    d_model, d_inner = 32, 64
    n_head, d_k, d_v = 8, 8, 8

    key = jax.random.PRNGKey(0)
    k_params, k_x = jax.random.split(key)
    params = init_layer_params(k_params, d_model, d_inner, n_head, d_k, d_v)
    packed = pack_layer_params(params)          # bf16 fused weights, done once
    enc_input = jax.random.normal(k_x, (B, L, d_model), dtype=jnp.float32)

    layer = make_local_encoder_layer(d_model, d_inner, n_head, d_k, d_v)
    enc_out, enc_slf_attn = jax.jit(layer)(enc_input, packed)
    enc_out = jax.block_until_ready(enc_out)
    enc_slf_attn = jax.block_until_ready(enc_slf_attn)

    assert enc_out.shape == (B, L, d_model)
    assert enc_slf_attn.shape == (n_head, B, L, L)

    # Sanity-check against a pure-JAX Precision.HIGHEST f32 reference.
    # Tolerances are sized for single-pass bf16 MXU matmuls (f32 accumulation)
    # and the approx-reciprocal softmax inside the kernel vs. the full-f32
    # reference.
    ref_out, ref_attn = _layer_ref(enc_input, params, n_head, d_k, d_v)
    assert jnp.allclose(enc_out, ref_out, atol=8e-2, rtol=8e-2)
    assert jnp.allclose(enc_slf_attn.astype(jnp.float32), ref_attn,
                        atol=5e-2, rtol=5e-2)

    print("KERNEL_OK")
</pallas_src>

<mosaic_0001>
module attributes {stable_mosaic.version = 11 : i64} {
  func.func @_encoder_layer_kernel(%arg0: i32, %arg1: memref<1x8x32xf32, #tpu.memory_space<vmem>>, %arg2: memref<32x192xbf16, #tpu.memory_space<vmem>>, %arg3: memref<64x32xbf16, #tpu.memory_space<vmem>>, %arg4: memref<1x32xf32, #tpu.memory_space<vmem>>, %arg5: memref<1x32xf32, #tpu.memory_space<vmem>>, %arg6: memref<1x32xf32, #tpu.memory_space<vmem>>, %arg7: memref<32x192xbf16, #tpu.memory_space<vmem>>, %arg8: memref<64x32xbf16, #tpu.memory_space<vmem>>, %arg9: memref<1x32xf32, #tpu.memory_space<vmem>>, %arg10: memref<1x32xf32, #tpu.memory_space<vmem>>, %arg11: memref<1x32xf32, #tpu.memory_space<vmem>>, %arg12: memref<32x64xbf16, #tpu.memory_space<vmem>>, %arg13: memref<1x64xf32, #tpu.memory_space<vmem>>, %arg14: memref<64x32xbf16, #tpu.memory_space<vmem>>, %arg15: memref<1x32xf32, #tpu.memory_space<vmem>>, %arg16: memref<1x32xf32, #tpu.memory_space<vmem>>, %arg17: memref<1x32xf32, #tpu.memory_space<vmem>>, %arg18: memref<1x8x32xf32, #tpu.memory_space<vmem>>, %arg19: memref<8x1x8x8xf32, #tpu.memory_space<vmem>>, %arg20: memref<8x64xbf16, #tpu.memory_space<vmem>>) attributes {dimension_semantics = [#tpu.dimension_semantics<parallel>], iteration_bounds = array<i64: 2>, scalar_prefetch = 0 : i64, scratch_operands = 1 : i64, tpu.core_type = #tpu.core_type<tc>, window_params = [{transform_indices = @transform_0, window_bounds = array<i64: 1, 8, 32>}, {pipeline_mode = #tpu.pipeline_mode<synchronous>, transform_indices = @transform_1, window_bounds = array<i64: 32, 192>}, {pipeline_mode = #tpu.pipeline_mode<synchronous>, transform_indices = @transform_2, window_bounds = array<i64: 64, 32>}, {pipeline_mode = #tpu.pipeline_mode<synchronous>, transform_indices = @transform_3, window_bounds = array<i64: 1, 32>}, {pipeline_mode = #tpu.pipeline_mode<synchronous>, transform_indices = @transform_4, window_bounds = array<i64: 1, 32>}, {pipeline_mode = #tpu.pipeline_mode<synchronous>, transform_indices = @transform_5, window_bounds = array<i64: 1, 32>}, {pipeline_mode = #tpu.pipeline_mode<synchronous>, transform_indices = @transform_6, window_bounds = array<i64: 32, 192>}, {pipeline_mode = #tpu.pipeline_mode<synchronous>, transform_indices = @transform_7, window_bounds = array<i64: 64, 32>}, {pipeline_mode = #tpu.pipeline_mode<synchronous>, transform_indices = @transform_8, window_bounds = array<i64: 1, 32>}, {pipeline_mode = #tpu.pipeline_mode<synchronous>, transform_indices = @transform_9, window_bounds = array<i64: 1, 32>}, {pipeline_mode = #tpu.pipeline_mode<synchronous>, transform_indices = @transform_10, window_bounds = array<i64: 1, 32>}, {pipeline_mode = #tpu.pipeline_mode<synchronous>, transform_indices = @transform_11, window_bounds = array<i64: 32, 64>}, {pipeline_mode = #tpu.pipeline_mode<synchronous>, transform_indices = @transform_12, window_bounds = array<i64: 1, 64>}, {pipeline_mode = #tpu.pipeline_mode<synchronous>, transform_indices = @transform_13, window_bounds = array<i64: 64, 32>}, {pipeline_mode = #tpu.pipeline_mode<synchronous>, transform_indices = @transform_14, window_bounds = array<i64: 1, 32>}, {pipeline_mode = #tpu.pipeline_mode<synchronous>, transform_indices = @transform_15, window_bounds = array<i64: 1, 32>}, {pipeline_mode = #tpu.pipeline_mode<synchronous>, transform_indices = @transform_16, window_bounds = array<i64: 1, 32>}, {transform_indices = @transform_17, window_bounds = array<i64: 1, 8, 32>}, {transform_indices = @transform_18, window_bounds = array<i64: 8, 1, 8, 8>}]} {
    %c0 = arith.constant 0 : index
    %c0_0 = arith.constant 0 : index
    %c0_1 = arith.constant 0 : index
    %0 = vector.load %arg1[%c0, %c0_0, %c0_1] : memref<1x8x32xf32, #tpu.memory_space<vmem>>, vector<1x8x32xf32>
    %1 = vector.shape_cast %0 : vector<1x8x32xf32> to vector<8x32xf32>
    %2 = arith.truncf %1 : vector<8x32xf32> to vector<8x32xbf16>
    %c0_2 = arith.constant 0 : index
    %c0_3 = arith.constant 0 : index
    %3 = vector.load %arg2[%c0_2, %c0_3] : memref<32x192xbf16, #tpu.memory_space<vmem>>, vector<32x192xbf16>
    %c0_4 = arith.constant 0 : index
    %c0_5 = arith.constant 0 : index
    %4 = vector.load %arg3[%c0_4, %c0_5] : memref<64x32xbf16, #tpu.memory_space<vmem>>, vector<64x32xbf16>
    %c0_6 = arith.constant 0 : index
    %c0_7 = arith.constant 0 : index
    %5 = vector.load %arg4[%c0_6, %c0_7] : memref<1x32xf32, #tpu.memory_space<vmem>>, vector<1x32xf32>
    %c0_8 = arith.constant 0 : index
    %c0_9 = arith.constant 0 : index
    %6 = vector.load %arg5[%c0_8, %c0_9] : memref<1x32xf32, #tpu.memory_space<vmem>>, vector<1x32xf32>
    %c0_10 = arith.constant 0 : index
    %c0_11 = arith.constant 0 : index
    %7 = vector.load %arg6[%c0_10, %c0_11] : memref<1x32xf32, #tpu.memory_space<vmem>>, vector<1x32xf32>
    %cst = arith.constant dense<0.000000e+00> : vector<8x192xf32>
    %8 = tpu.matmul %2, %3, %cst {dimension_numbers = #tpu.dot_dimension_numbers<[1], [0], [0], [1], [0, 0, 1, 1], [], []>} : vector<8x32xbf16>, vector<32x192xbf16>, vector<8x192xf32> -> vector<8x192xf32>
    %9 = vector.extract_strided_slice %8 {offsets = [0, 0], sizes = [8, 64], strides = [1, 1]} : vector<8x192xf32> to vector<8x64xf32>
    %cst_12 = arith.constant 0.176776692 : f32
    %10 = vector.broadcast %cst_12 : f32 to vector<8x64xf32>
    %11 = arith.mulf %9, %10 : vector<8x64xf32>
    %12 = arith.truncf %11 : vector<8x64xf32> to vector<8x64xbf16>
    %13 = vector.extract_strided_slice %8 {offsets = [0, 64], sizes = [8, 64], strides = [1, 1]} : vector<8x192xf32> to vector<8x64xf32>
    %14 = arith.truncf %13 : vector<8x64xf32> to vector<8x64xbf16>
    %15 = vector.extract_strided_slice %8 {offsets = [0, 128], sizes = [8, 64], strides = [1, 1]} : vector<8x192xf32> to vector<8x64xf32>
    %16 = arith.truncf %15 : vector<8x64xf32> to vector<8x64xbf16>
    %17 = vector.extract_strided_slice %12 {offsets = [0, 0], sizes = [8, 32], strides = [1, 1]} : vector<8x64xbf16> to vector<8x32xbf16>
    %18 = vector.extract_strided_slice %14 {offsets = [0, 0], sizes = [8, 32], strides = [1, 1]} : vector<8x64xbf16> to vector<8x32xbf16>
    %19 = vector.extract_strided_slice %16 {offsets = [0, 0], sizes = [8, 32], strides = [1, 1]} : vector<8x64xbf16> to vector<8x32xbf16>
    %cst_13 = arith.constant dense<0.000000e+00> : vector<8x8xf32>
    %20 = tpu.matmul %17, %18, %cst_13 {dimension_numbers = #tpu.dot_dimension_numbers<[1], [1], [0], [0], [0, 0, 1, 0], [], []>} : vector<8x32xbf16>, vector<8x32xbf16>, vector<8x8xf32> -> vector<8x8xf32>
    %cst_14 = arith.constant dense<0xFF800000> : vector<8xf32>
    %21 = vector.multi_reduction <maximumf>, %20, %cst_14 [1] : vector<8x8xf32> to vector<8xf32>
    %22 = vector.shape_cast %21 : vector<8xf32> to vector<8x1xf32>
    %23 = vector.broadcast %22 : vector<8x1xf32> to vector<8x8xf32>
    %24 = arith.subf %20, %23 : vector<8x8xf32>
    %25 = math.exp %24 : vector<8x8xf32>
    %cst_15 = arith.constant dense<0.000000e+00> : vector<8xf32>
    %26 = vector.multi_reduction <add>, %25, %cst_15 [1] : vector<8x8xf32> to vector<8xf32>
    %27 = vector.shape_cast %26 : vector<8xf32> to vector<8x1xf32>
    %28 = tpu.reciprocal %27 {approx = true} : vector<8x1xf32> -> vector<8x1xf32>
    %29 = vector.broadcast %28 : vector<8x1xf32> to vector<8x8xf32>
    %30 = arith.mulf %25, %29 : vector<8x8xf32>
    %31 = arith.truncf %30 : vector<8x8xf32> to vector<8x8xbf16>
    %cst_16 = arith.constant dense<0.000000e+00> : vector<8x32xf32>
    %32 = tpu.matmul %31, %19, %cst_16 {dimension_numbers = #tpu.dot_dimension_numbers<[1], [0], [0], [1], [0, 0, 1, 1], [], []>} : vector<8x8xbf16>, vector<8x32xbf16>, vector<8x32xf32> -> vector<8x32xf32>
    %33 = arith.truncf %32 : vector<8x32xf32> to vector<8x32xbf16>
    %c0_17 = arith.constant 0 : index
    %c0_18 = arith.constant 0 : index
    %34 = vector.load %arg20[%c0_17, %c0_18] : memref<8x64xbf16, #tpu.memory_space<vmem>>, vector<8x32xbf16>
    tpu.vector_store %arg20[%c0_17, %c0_18], %33 {strides = array<i32>} : memref<8x64xbf16, #tpu.memory_space<vmem>>, vector<8x32xbf16>,
    %35 = vector.extract_strided_slice %12 {offsets = [0, 32], sizes = [8, 32], strides = [1, 1]} : vector<8x64xbf16> to vector<8x32xbf16>
    %36 = vector.extract_strided_slice %14 {offsets = [0, 32], sizes = [8, 32], strides = [1, 1]} : vector<8x64xbf16> to vector<8x32xbf16>
    %37 = vector.extract_strided_slice %16 {offsets = [0, 32], sizes = [8, 32], strides = [1, 1]} : vector<8x64xbf16> to vector<8x32xbf16>
    %cst_19 = arith.constant dense<0.000000e+00> : vector<8x8xf32>
    %38 = tpu.matmul %35, %36, %cst_19 {dimension_numbers = #tpu.dot_dimension_numbers<[1], [1], [0], [0], [0, 0, 1, 0], [], []>} : vector<8x32xbf16>, vector<8x32xbf16>, vector<8x8xf32> -> vector<8x8xf32>
    %cst_20 = arith.constant dense<0xFF800000> : vector<8xf32>
    %39 = vector.multi_reduction <maximumf>, %38, %cst_20 [1] : vector<8x8xf32> to vector<8xf32>
    %40 = vector.shape_cast %39 : vector<8xf32> to vector<8x1xf32>
    %41 = vector.broadcast %40 : vector<8x1xf32> to vector<8x8xf32>
    %42 = arith.subf %38, %41 : vector<8x8xf32>
    %43 = math.exp %42 : vector<8x8xf32>
    %cst_21 = arith.constant dense<0.000000e+00> : vector<8xf32>
    %44 = vector.multi_reduction <add>, %43, %cst_21 [1] : vector<8x8xf32> to vector<8xf32>
    %45 = vector.shape_cast %44 : vector<8xf32> to vector<8x1xf32>
    %46 = tpu.reciprocal %45 {approx = true} : vector<8x1xf32> -> vector<8x1xf32>
    %47 = vector.broadcast %46 : vector<8x1xf32> to vector<8x8xf32>
    %48 = arith.mulf %43, %47 : vector<8x8xf32>
    %49 = arith.truncf %48 : vector<8x8xf32> to vector<8x8xbf16>
    %cst_22 = arith.constant dense<0.000000e+00> : vector<8x32xf32>
    %50 = tpu.matmul %49, %37, %cst_22 {dimension_numbers = #tpu.dot_dimension_numbers<[1], [0], [0], [1], [0, 0, 1, 1], [], []>} : vector<8x8xbf16>, vector<8x32xbf16>, vector<8x32xf32> -> vector<8x32xf32>
    %51 = arith.truncf %50 : vector<8x32xf32> to vector<8x32xbf16>
    %c0_23 = arith.constant 0 : index
    %c32 = arith.constant 32 : index
    %52 = vector.load %arg20[%c0_23, %c32] : memref<8x64xbf16, #tpu.memory_space<vmem>>, vector<8x32xbf16>
    tpu.vector_store %arg20[%c0_23, %c32], %51 {strides = array<i32>} : memref<8x64xbf16, #tpu.memory_space<vmem>>, vector<8x32xbf16>,
    %c0_24 = arith.constant 0 : index
    %c0_25 = arith.constant 0 : index
    %53 = vector.load %arg20[%c0_24, %c0_25] : memref<8x64xbf16, #tpu.memory_space<vmem>>, vector<8x64xbf16>
    %cst_26 = arith.constant dense<0.000000e+00> : vector<8x32xf32>
    %54 = tpu.matmul %53, %4, %cst_26 {dimension_numbers = #tpu.dot_dimension_numbers<[1], [0], [0], [1], [0, 0, 1, 1], [], []>} : vector<8x64xbf16>, vector<64x32xbf16>, vector<8x32xf32> -> vector<8x32xf32>
    %55 = vector.broadcast %5 : vector<1x32xf32> to vector<8x32xf32>
    %56 = arith.addf %54, %55 : vector<8x32xf32>
    %57 = arith.addf %56, %1 : vector<8x32xf32>
    %cst_27 = arith.constant dense<0.000000e+00> : vector<8xf32>
    %58 = vector.multi_reduction <add>, %57, %cst_27 [1] : vector<8x32xf32> to vector<8xf32>
    %59 = vector.shape_cast %58 : vector<8xf32> to vector<8x1xf32>
    %cst_28 = arith.constant 3.200000e+01 : f32
    %60 = vector.broadcast %cst_28 : f32 to vector<8x1xf32>
    %61 = arith.divf %59, %60 : vector<8x1xf32>
    %62 = vector.broadcast %61 : vector<8x1xf32> to vector<8x32xf32>
    %63 = arith.subf %57, %62 : vector<8x32xf32>
    %64 = arith.mulf %63, %63 : vector<8x32xf32>
    %cst_29 = arith.constant dense<0.000000e+00> : vector<8xf32>
    %65 = vector.multi_reduction <add>, %64, %cst_29 [1] : vector<8x32xf32> to vector<8xf32>
    %66 = vector.shape_cast %65 : vector<8xf32> to vector<8x1xf32>
    %cst_30 = arith.constant 3.200000e+01 : f32
    %67 = vector.broadcast %cst_30 : f32 to vector<8x1xf32>
    %68 = arith.divf %66, %67 : vector<8x1xf32>
    %69 = vector.broadcast %61 : vector<8x1xf32> to vector<8x32xf32>
    %70 = arith.subf %57, %69 : vector<8x32xf32>
    %cst_31 = arith.constant 9.99999974E-6 : f32
    %71 = vector.broadcast %cst_31 : f32 to vector<8x1xf32>
    %72 = arith.addf %68, %71 : vector<8x1xf32>
    %73 = math.rsqrt %72 : vector<8x1xf32>
    %74 = vector.broadcast %73 : vector<8x1xf32> to vector<8x32xf32>
    %75 = arith.mulf %70, %74 : vector<8x32xf32>
    %76 = vector.broadcast %6 : vector<1x32xf32> to vector<8x32xf32>
    %77 = arith.mulf %75, %76 : vector<8x32xf32>
    %78 = vector.broadcast %7 : vector<1x32xf32> to vector<8x32xf32>
    %79 = arith.addf %77, %78 : vector<8x32xf32>
    %80 = arith.truncf %79 : vector<8x32xf32> to vector<8x32xbf16>
    %c0_32 = arith.constant 0 : index
    %c0_33 = arith.constant 0 : index
    %81 = vector.load %arg7[%c0_32, %c0_33] : memref<32x192xbf16, #tpu.memory_space<vmem>>, vector<32x192xbf16>
    %c0_34 = arith.constant 0 : index
    %c0_35 = arith.constant 0 : index
    %82 = vector.load %arg8[%c0_34, %c0_35] : memref<64x32xbf16, #tpu.memory_space<vmem>>, vector<64x32xbf16>
    %c0_36 = arith.constant 0 : index
    %c0_37 = arith.constant 0 : index
    %83 = vector.load %arg9[%c0_36, %c0_37] : memref<1x32xf32, #tpu.memory_space<vmem>>, vector<1x32xf32>
    %c0_38 = arith.constant 0 : index
    %c0_39 = arith.constant 0 : index
    %84 = vector.load %arg10[%c0_38, %c0_39] : memref<1x32xf32, #tpu.memory_space<vmem>>, vector<1x32xf32>
    %c0_40 = arith.constant 0 : index
    %c0_41 = arith.constant 0 : index
    %85 = vector.load %arg11[%c0_40, %c0_41] : memref<1x32xf32, #tpu.memory_space<vmem>>, vector<1x32xf32>
    %cst_42 = arith.constant dense<0.000000e+00> : vector<8x192xf32>
    %86 = tpu.matmul %80, %81, %cst_42 {dimension_numbers = #tpu.dot_dimension_numbers<[1], [0], [0], [1], [0, 0, 1, 1], [], []>} : vector<8x32xbf16>, vector<32x192xbf16>, vector<8x192xf32> -> vector<8x192xf32>
    %87 = vector.extract_strided_slice %86 {offsets = [0, 0], sizes = [8, 64], strides = [1, 1]} : vector<8x192xf32> to vector<8x64xf32>
    %cst_43 = arith.constant 0.353553385 : f32
    %88 = vector.broadcast %cst_43 : f32 to vector<8x64xf32>
    %89 = arith.mulf %87, %88 : vector<8x64xf32>
    %90 = arith.truncf %89 : vector<8x64xf32> to vector<8x64xbf16>
    %91 = vector.extract_strided_slice %86 {offsets = [0, 64], sizes = [8, 64], strides = [1, 1]} : vector<8x192xf32> to vector<8x64xf32>
    %92 = arith.truncf %91 : vector<8x64xf32> to vector<8x64xbf16>
    %93 = vector.extract_strided_slice %86 {offsets = [0, 128], sizes = [8, 64], strides = [1, 1]} : vector<8x192xf32> to vector<8x64xf32>
    %94 = arith.truncf %93 : vector<8x64xf32> to vector<8x64xbf16>
    %95 = vector.extract_strided_slice %90 {offsets = [0, 0], sizes = [8, 8], strides = [1, 1]} : vector<8x64xbf16> to vector<8x8xbf16>
    %96 = vector.extract_strided_slice %92 {offsets = [0, 0], sizes = [8, 8], strides = [1, 1]} : vector<8x64xbf16> to vector<8x8xbf16>
    %97 = vector.extract_strided_slice %94 {offsets = [0, 0], sizes = [8, 8], strides = [1, 1]} : vector<8x64xbf16> to vector<8x8xbf16>
    %cst_44 = arith.constant dense<0.000000e+00> : vector<8x8xf32>
    %98 = tpu.matmul %95, %96, %cst_44 {dimension_numbers = #tpu.dot_dimension_numbers<[1], [1], [0], [0], [0, 0, 1, 0], [], []>} : vector<8x8xbf16>, vector<8x8xbf16>, vector<8x8xf32> -> vector<8x8xf32>
    %cst_45 = arith.constant dense<0xFF800000> : vector<8xf32>
    %99 = vector.multi_reduction <maximumf>, %98, %cst_45 [1] : vector<8x8xf32> to vector<8xf32>
    %100 = vector.shape_cast %99 : vector<8xf32> to vector<8x1xf32>
    %101 = vector.broadcast %100 : vector<8x1xf32> to vector<8x8xf32>
    %102 = arith.subf %98, %101 : vector<8x8xf32>
    %103 = math.exp %102 : vector<8x8xf32>
    %cst_46 = arith.constant dense<0.000000e+00> : vector<8xf32>
    %104 = vector.multi_reduction <add>, %103, %cst_46 [1] : vector<8x8xf32> to vector<8xf32>
    %105 = vector.shape_cast %104 : vector<8xf32> to vector<8x1xf32>
    %106 = tpu.reciprocal %105 {approx = true} : vector<8x1xf32> -> vector<8x1xf32>
    %107 = vector.broadcast %106 : vector<8x1xf32> to vector<8x8xf32>
    %108 = arith.mulf %103, %107 : vector<8x8xf32>
    %c0_47 = arith.constant 0 : index
    %c0_48 = arith.constant 0 : index
    %c0_49 = arith.constant 0 : index
    %c0_50 = arith.constant 0 : index
    %109 = vector.load %arg19[%c0_47, %c0_48, %c0_49, %c0_50] : memref<8x1x8x8xf32, #tpu.memory_space<vmem>>, vector<1x1x8x8xf32>
    %110 = vector.shape_cast %109 : vector<1x1x8x8xf32> to vector<8x8xf32>
    %111 = vector.shape_cast %108 : vector<8x8xf32> to vector<1x1x8x8xf32>
    tpu.vector_store %arg19[%c0_47, %c0_48, %c0_49, %c0_50], %111 {strides = array<i32>} : memref<8x1x8x8xf32, #tpu.memory_space<vmem>>, vector<1x1x8x8xf32>,
    %112 = arith.truncf %108 : vector<8x8xf32> to vector<8x8xbf16>
    %cst_51 = arith.constant dense<0.000000e+00> : vector<8x8xf32>
    %113 = tpu.matmul %112, %97, %cst_51 {dimension_numbers = #tpu.dot_dimension_numbers<[1], [0], [0], [1], [0, 0, 1, 1], [], []>} : vector<8x8xbf16>, vector<8x8xbf16>, vector<8x8xf32> -> vector<8x8xf32>
    %114 = arith.truncf %113 : vector<8x8xf32> to vector<8x8xbf16>
    %c0_52 = arith.constant 0 : index
    %c0_53 = arith.constant 0 : index
    %115 = vector.load %arg20[%c0_52, %c0_53] : memref<8x64xbf16, #tpu.memory_space<vmem>>, vector<8x8xbf16>
    tpu.vector_store %arg20[%c0_52, %c0_53], %114 {strides = array<i32>} : memref<8x64xbf16, #tpu.memory_space<vmem>>, vector<8x8xbf16>,
    %116 = vector.extract_strided_slice %90 {offsets = [0, 8], sizes = [8, 8], strides = [1, 1]} : vector<8x64xbf16> to vector<8x8xbf16>
    %117 = vector.extract_strided_slice %92 {offsets = [0, 8], sizes = [8, 8], strides = [1, 1]} : vector<8x64xbf16> to vector<8x8xbf16>
    %118 = vector.extract_strided_slice %94 {offsets = [0, 8], sizes = [8, 8], strides = [1, 1]} : vector<8x64xbf16> to vector<8x8xbf16>
    %cst_54 = arith.constant dense<0.000000e+00> : vector<8x8xf32>
    %119 = tpu.matmul %116, %117, %cst_54 {dimension_numbers = #tpu.dot_dimension_numbers<[1], [1], [0], [0], [0, 0, 1, 0], [], []>} : vector<8x8xbf16>, vector<8x8xbf16>, vector<8x8xf32> -> vector<8x8xf32>
    %cst_55 = arith.constant dense<0xFF800000> : vector<8xf32>
    %120 = vector.multi_reduction <maximumf>, %119, %cst_55 [1] : vector<8x8xf32> to vector<8xf32>
    %121 = vector.shape_cast %120 : vector<8xf32> to vector<8x1xf32>
    %122 = vector.broadcast %121 : vector<8x1xf32> to vector<8x8xf32>
    %123 = arith.subf %119, %122 : vector<8x8xf32>
    %124 = math.exp %123 : vector<8x8xf32>
    %cst_56 = arith.constant dense<0.000000e+00> : vector<8xf32>
    %125 = vector.multi_reduction <add>, %124, %cst_56 [1] : vector<8x8xf32> to vector<8xf32>
    %126 = vector.shape_cast %125 : vector<8xf32> to vector<8x1xf32>
    %127 = tpu.reciprocal %126 {approx = true} : vector<8x1xf32> -> vector<8x1xf32>
    %128 = vector.broadcast %127 : vector<8x1xf32> to vector<8x8xf32>
    %129 = arith.mulf %124, %128 : vector<8x8xf32>
    %c1 = arith.constant 1 : index
    %c0_57 = arith.constant 0 : index
    %c0_58 = arith.constant 0 : index
    %c0_59 = arith.constant 0 : index
    %130 = vector.load %arg19[%c1, %c0_57, %c0_58, %c0_59] : memref<8x1x8x8xf32, #tpu.memory_space<vmem>>, vector<1x1x8x8xf32>
    %131 = vector.shape_cast %130 : vector<1x1x8x8xf32> to vector<8x8xf32>
    %132 = vector.shape_cast %129 : vector<8x8xf32> to vector<1x1x8x8xf32>
    tpu.vector_store %arg19[%c1, %c0_57, %c0_58, %c0_59], %132 {strides = array<i32>} : memref<8x1x8x8xf32, #tpu.memory_space<vmem>>, vector<1x1x8x8xf32>,
    %133 = arith.truncf %129 : vector<8x8xf32> to vector<8x8xbf16>
    %cst_60 = arith.constant dense<0.000000e+00> : vector<8x8xf32>
    %134 = tpu.matmul %133, %118, %cst_60 {dimension_numbers = #tpu.dot_dimension_numbers<[1], [0], [0], [1], [0, 0, 1, 1], [], []>} : vector<8x8xbf16>, vector<8x8xbf16>, vector<8x8xf32> -> vector<8x8xf32>
    %135 = arith.truncf %134 : vector<8x8xf32> to vector<8x8xbf16>
    %c0_61 = arith.constant 0 : index
    %c8 = arith.constant 8 : index
    %136 = vector.load %arg20[%c0_61, %c8] : memref<8x64xbf16, #tpu.memory_space<vmem>>, vector<8x8xbf16>
    tpu.vector_store %arg20[%c0_61, %c8], %135 {strides = array<i32>} : memref<8x64xbf16, #tpu.memory_space<vmem>>, vector<8x8xbf16>,
    %137 = vector.extract_strided_slice %90 {offsets = [0, 16], sizes = [8, 8], strides = [1, 1]} : vector<8x64xbf16> to vector<8x8xbf16>
    %138 = vector.extract_strided_slice %92 {offsets = [0, 16], sizes = [8, 8], strides = [1, 1]} : vector<8x64xbf16> to vector<8x8xbf16>
    %139 = vector.extract_strided_slice %94 {offsets = [0, 16], sizes = [8, 8], strides = [1, 1]} : vector<8x64xbf16> to vector<8x8xbf16>
    %cst_62 = arith.constant dense<0.000000e+00> : vector<8x8xf32>
    %140 = tpu.matmul %137, %138, %cst_62 {dimension_numbers = #tpu.dot_dimension_numbers<[1], [1], [0], [0], [0, 0, 1, 0], [], []>} : vector<8x8xbf16>, vector<8x8xbf16>, vector<8x8xf32> -> vector<8x8xf32>
    %cst_63 = arith.constant dense<0xFF800000> : vector<8xf32>
    %141 = vector.multi_reduction <maximumf>, %140, %cst_63 [1] : vector<8x8xf32> to vector<8xf32>
    %142 = vector.shape_cast %141 : vector<8xf32> to vector<8x1xf32>
    %143 = vector.broadcast %142 : vector<8x1xf32> to vector<8x8xf32>
    %144 = arith.subf %140, %143 : vector<8x8xf32>
    %145 = math.exp %144 : vector<8x8xf32>
    %cst_64 = arith.constant dense<0.000000e+00> : vector<8xf32>
    %146 = vector.multi_reduction <add>, %145, %cst_64 [1] : vector<8x8xf32> to vector<8xf32>
    %147 = vector.shape_cast %146 : vector<8xf32> to vector<8x1xf32>
    %148 = tpu.reciprocal %147 {approx = true} : vector<8x1xf32> -> vector<8x1xf32>
    %149 = vector.broadcast %148 : vector<8x1xf32> to vector<8x8xf32>
    %150 = arith.mulf %145, %149 : vector<8x8xf32>
    %c2 = arith.constant 2 : index
    %c0_65 = arith.constant 0 : index
    %c0_66 = arith.constant 0 : index
    %c0_67 = arith.constant 0 : index
    %151 = vector.load %arg19[%c2, %c0_65, %c0_66, %c0_67] : memref<8x1x8x8xf32, #tpu.memory_space<vmem>>, vector<1x1x8x8xf32>
    %152 = vector.shape_cast %151 : vector<1x1x8x8xf32> to vector<8x8xf32>
    %153 = vector.shape_cast %150 : vector<8x8xf32> to vector<1x1x8x8xf32>
    tpu.vector_store %arg19[%c2, %c0_65, %c0_66, %c0_67], %153 {strides = array<i32>} : memref<8x1x8x8xf32, #tpu.memory_space<vmem>>, vector<1x1x8x8xf32>,
    %154 = arith.truncf %150 : vector<8x8xf32> to vector<8x8xbf16>
    %cst_68 = arith.constant dense<0.000000e+00> : vector<8x8xf32>
    %155 = tpu.matmul %154, %139, %cst_68 {dimension_numbers = #tpu.dot_dimension_numbers<[1], [0], [0], [1], [0, 0, 1, 1], [], []>} : vector<8x8xbf16>, vector<8x8xbf16>, vector<8x8xf32> -> vector<8x8xf32>
    %156 = arith.truncf %155 : vector<8x8xf32> to vector<8x8xbf16>
    %c0_69 = arith.constant 0 : index
    %c16 = arith.constant 16 : index
    %157 = vector.load %arg20[%c0_69, %c16] : memref<8x64xbf16, #tpu.memory_space<vmem>>, vector<8x8xbf16>
    tpu.vector_store %arg20[%c0_69, %c16], %156 {strides = array<i32>} : memref<8x64xbf16, #tpu.memory_space<vmem>>, vector<8x8xbf16>,
    %158 = vector.extract_strided_slice %90 {offsets = [0, 24], sizes = [8, 8], strides = [1, 1]} : vector<8x64xbf16> to vector<8x8xbf16>
    %159 = vector.extract_strided_slice %92 {offsets = [0, 24], sizes = [8, 8], strides = [1, 1]} : vector<8x64xbf16> to vector<8x8xbf16>
    %160 = vector.extract_strided_slice %94 {offsets = [0, 24], sizes = [8, 8], strides = [1, 1]} : vector<8x64xbf16> to vector<8x8xbf16>
    %cst_70 = arith.constant dense<0.000000e+00> : vector<8x8xf32>
    %161 = tpu.matmul %158, %159, %cst_70 {dimension_numbers = #tpu.dot_dimension_numbers<[1], [1], [0], [0], [0, 0, 1, 0], [], []>} : vector<8x8xbf16>, vector<8x8xbf16>, vector<8x8xf32> -> vector<8x8xf32>
    %cst_71 = arith.constant dense<0xFF800000> : vector<8xf32>
    %162 = vector.multi_reduction <maximumf>, %161, %cst_71 [1] : vector<8x8xf32> to vector<8xf32>
    %163 = vector.shape_cast %162 : vector<8xf32> to vector<8x1xf32>
    %164 = vector.broadcast %163 : vector<8x1xf32> to vector<8x8xf32>
    %165 = arith.subf %161, %164 : vector<8x8xf32>
    %166 = math.exp %165 : vector<8x8xf32>
    %cst_72 = arith.constant dense<0.000000e+00> : vector<8xf32>
    %167 = vector.multi_reduction <add>, %166, %cst_72 [1] : vector<8x8xf32> to vector<8xf32>
    %168 = vector.shape_cast %167 : vector<8xf32> to vector<8x1xf32>
    %169 = tpu.reciprocal %168 {approx = true} : vector<8x1xf32> -> vector<8x1xf32>
    %170 = vector.broadcast %169 : vector<8x1xf32> to vector<8x8xf32>
    %171 = arith.mulf %166, %170 : vector<8x8xf32>
    %c3 = arith.constant 3 : index
    %c0_73 = arith.constant 0 : index
    %c0_74 = arith.constant 0 : index
    %c0_75 = arith.constant 0 : index
    %172 = vector.load %arg19[%c3, %c0_73, %c0_74, %c0_75] : memref<8x1x8x8xf32, #tpu.memory_space<vmem>>, vector<1x1x8x8xf32>
    %173 = vector.shape_cast %172 : vector<1x1x8x8xf32> to vector<8x8xf32>
    %174 = vector.shape_cast %171 : vector<8x8xf32> to vector<1x1x8x8xf32>
    tpu.vector_store %arg19[%c3, %c0_73, %c0_74, %c0_75], %174 {strides = array<i32>} : memref<8x1x8x8xf32, #tpu.memory_space<vmem>>, vector<1x1x8x8xf32>,
    %175 = arith.truncf %171 : vector<8x8xf32> to vector<8x8xbf16>
    %cst_76 = arith.constant dense<0.000000e+00> : vector<8x8xf32>
    %176 = tpu.matmul %175, %160, %cst_76 {dimension_numbers = #tpu.dot_dimension_numbers<[1], [0], [0], [1], [0, 0, 1, 1], [], []>} : vector<8x8xbf16>, vector<8x8xbf16>, vector<8x8xf32> -> vector<8x8xf32>
    %177 = arith.truncf %176 : vector<8x8xf32> to vector<8x8xbf16>
    %c0_77 = arith.constant 0 : index
    %c24 = arith.constant 24 : index
    %178 = vector.load %arg20[%c0_77, %c24] : memref<8x64xbf16, #tpu.memory_space<vmem>>, vector<8x8xbf16>
    tpu.vector_store %arg20[%c0_77, %c24], %177 {strides = array<i32>} : memref<8x64xbf16, #tpu.memory_space<vmem>>, vector<8x8xbf16>,
    %179 = vector.extract_strided_slice %90 {offsets = [0, 32], sizes = [8, 8], strides = [1, 1]} : vector<8x64xbf16> to vector<8x8xbf16>
    %180 = vector.extract_strided_slice %92 {offsets = [0, 32], sizes = [8, 8], strides = [1, 1]} : vector<8x64xbf16> to vector<8x8xbf16>
    %181 = vector.extract_strided_slice %94 {offsets = [0, 32], sizes = [8, 8], strides = [1, 1]} : vector<8x64xbf16> to vector<8x8xbf16>
    %cst_78 = arith.constant dense<0.000000e+00> : vector<8x8xf32>
    %182 = tpu.matmul %179, %180, %cst_78 {dimension_numbers = #tpu.dot_dimension_numbers<[1], [1], [0], [0], [0, 0, 1, 0], [], []>} : vector<8x8xbf16>, vector<8x8xbf16>, vector<8x8xf32> -> vector<8x8xf32>
    %cst_79 = arith.constant dense<0xFF800000> : vector<8xf32>
    %183 = vector.multi_reduction <maximumf>, %182, %cst_79 [1] : vector<8x8xf32> to vector<8xf32>
    %184 = vector.shape_cast %183 : vector<8xf32> to vector<8x1xf32>
    %185 = vector.broadcast %184 : vector<8x1xf32> to vector<8x8xf32>
    %186 = arith.subf %182, %185 : vector<8x8xf32>
    %187 = math.exp %186 : vector<8x8xf32>
    %cst_80 = arith.constant dense<0.000000e+00> : vector<8xf32>
    %188 = vector.multi_reduction <add>, %187, %cst_80 [1] : vector<8x8xf32> to vector<8xf32>
    %189 = vector.shape_cast %188 : vector<8xf32> to vector<8x1xf32>
    %190 = tpu.reciprocal %189 {approx = true} : vector<8x1xf32> -> vector<8x1xf32>
    %191 = vector.broadcast %190 : vector<8x1xf32> to vector<8x8xf32>
    %192 = arith.mulf %187, %191 : vector<8x8xf32>
    %c4 = arith.constant 4 : index
    %c0_81 = arith.constant 0 : index
    %c0_82 = arith.constant 0 : index
    %c0_83 = arith.constant 0 : index
    %193 = vector.load %arg19[%c4, %c0_81, %c0_82, %c0_83] : memref<8x1x8x8xf32, #tpu.memory_space<vmem>>, vector<1x1x8x8xf32>
    %194 = vector.shape_cast %193 : vector<1x1x8x8xf32> to vector<8x8xf32>
    %195 = vector.shape_cast %192 : vector<8x8xf32> to vector<1x1x8x8xf32>
    tpu.vector_store %arg19[%c4, %c0_81, %c0_82, %c0_83], %195 {strides = array<i32>} : memref<8x1x8x8xf32, #tpu.memory_space<vmem>>, vector<1x1x8x8xf32>,
    %196 = arith.truncf %192 : vector<8x8xf32> to vector<8x8xbf16>
    %cst_84 = arith.constant dense<0.000000e+00> : vector<8x8xf32>
    %197 = tpu.matmul %196, %181, %cst_84 {dimension_numbers = #tpu.dot_dimension_numbers<[1], [0], [0], [1], [0, 0, 1, 1], [], []>} : vector<8x8xbf16>, vector<8x8xbf16>, vector<8x8xf32> -> vector<8x8xf32>
    %198 = arith.truncf %197 : vector<8x8xf32> to vector<8x8xbf16>
    %c0_85 = arith.constant 0 : index
    %c32_86 = arith.constant 32 : index
    %199 = vector.load %arg20[%c0_85, %c32_86] : memref<8x64xbf16, #tpu.memory_space<vmem>>, vector<8x8xbf16>
    tpu.vector_store %arg20[%c0_85, %c32_86], %198 {strides = array<i32>} : memref<8x64xbf16, #tpu.memory_space<vmem>>, vector<8x8xbf16>,
    %200 = vector.extract_strided_slice %90 {offsets = [0, 40], sizes = [8, 8], strides = [1, 1]} : vector<8x64xbf16> to vector<8x8xbf16>
    %201 = vector.extract_strided_slice %92 {offsets = [0, 40], sizes = [8, 8], strides = [1, 1]} : vector<8x64xbf16> to vector<8x8xbf16>
    %202 = vector.extract_strided_slice %94 {offsets = [0, 40], sizes = [8, 8], strides = [1, 1]} : vector<8x64xbf16> to vector<8x8xbf16>
    %cst_87 = arith.constant dense<0.000000e+00> : vector<8x8xf32>
    %203 = tpu.matmul %200, %201, %cst_87 {dimension_numbers = #tpu.dot_dimension_numbers<[1], [1], [0], [0], [0, 0, 1, 0], [], []>} : vector<8x8xbf16>, vector<8x8xbf16>, vector<8x8xf32> -> vector<8x8xf32>
    %cst_88 = arith.constant dense<0xFF800000> : vector<8xf32>
    %204 = vector.multi_reduction <maximumf>, %203, %cst_88 [1] : vector<8x8xf32> to vector<8xf32>
    %205 = vector.shape_cast %204 : vector<8xf32> to vector<8x1xf32>
    %206 = vector.broadcast %205 : vector<8x1xf32> to vector<8x8xf32>
    %207 = arith.subf %203, %206 : vector<8x8xf32>
    %208 = math.exp %207 : vector<8x8xf32>
    %cst_89 = arith.constant dense<0.000000e+00> : vector<8xf32>
    %209 = vector.multi_reduction <add>, %208, %cst_89 [1] : vector<8x8xf32> to vector<8xf32>
    %210 = vector.shape_cast %209 : vector<8xf32> to vector<8x1xf32>
    %211 = tpu.reciprocal %210 {approx = true} : vector<8x1xf32> -> vector<8x1xf32>
    %212 = vector.broadcast %211 : vector<8x1xf32> to vector<8x8xf32>
    %213 = arith.mulf %208, %212 : vector<8x8xf32>
    %c5 = arith.constant 5 : index
    %c0_90 = arith.constant 0 : index
    %c0_91 = arith.constant 0 : index
    %c0_92 = arith.constant 0 : index
    %214 = vector.load %arg19[%c5, %c0_90, %c0_91, %c0_92] : memref<8x1x8x8xf32, #tpu.memory_space<vmem>>, vector<1x1x8x8xf32>
    %215 = vector.shape_cast %214 : vector<1x1x8x8xf32> to vector<8x8xf32>
    %216 = vector.shape_cast %213 : vector<8x8xf32> to vector<1x1x8x8xf32>
    tpu.vector_store %arg19[%c5, %c0_90, %c0_91, %c0_92], %216 {strides = array<i32>} : memref<8x1x8x8xf32, #tpu.memory_space<vmem>>, vector<1x1x8x8xf32>,
    %217 = arith.truncf %213 : vector<8x8xf32> to vector<8x8xbf16>
    %cst_93 = arith.constant dense<0.000000e+00> : vector<8x8xf32>
    %218 = tpu.matmul %217, %202, %cst_93 {dimension_numbers = #tpu.dot_dimension_numbers<[1], [0], [0], [1], [0, 0, 1, 1], [], []>} : vector<8x8xbf16>, vector<8x8xbf16>, vector<8x8xf32> -> vector<8x8xf32>
    %219 = arith.truncf %218 : vector<8x8xf32> to vector<8x8xbf16>
    %c0_94 = arith.constant 0 : index
    %c40 = arith.constant 40 : index
    %220 = vector.load %arg20[%c0_94, %c40] : memref<8x64xbf16, #tpu.memory_space<vmem>>, vector<8x8xbf16>
    tpu.vector_store %arg20[%c0_94, %c40], %219 {strides = array<i32>} : memref<8x64xbf16, #tpu.memory_space<vmem>>, vector<8x8xbf16>,
    %221 = vector.extract_strided_slice %90 {offsets = [0, 48], sizes = [8, 8], strides = [1, 1]} : vector<8x64xbf16> to vector<8x8xbf16>
    %222 = vector.extract_strided_slice %92 {offsets = [0, 48], sizes = [8, 8], strides = [1, 1]} : vector<8x64xbf16> to vector<8x8xbf16>
    %223 = vector.extract_strided_slice %94 {offsets = [0, 48], sizes = [8, 8], strides = [1, 1]} : vector<8x64xbf16> to vector<8x8xbf16>
    %cst_95 = arith.constant dense<0.000000e+00> : vector<8x8xf32>
    %224 = tpu.matmul %221, %222, %cst_95 {dimension_numbers = #tpu.dot_dimension_numbers<[1], [1], [0], [0], [0, 0, 1, 0], [], []>} : vector<8x8xbf16>, vector<8x8xbf16>, vector<8x8xf32> -> vector<8x8xf32>
    %cst_96 = arith.constant dense<0xFF800000> : vector<8xf32>
    %225 = vector.multi_reduction <maximumf>, %224, %cst_96 [1] : vector<8x8xf32> to vector<8xf32>
    %226 = vector.shape_cast %225 : vector<8xf32> to vector<8x1xf32>
    %227 = vector.broadcast %226 : vector<8x1xf32> to vector<8x8xf32>
    %228 = arith.subf %224, %227 : vector<8x8xf32>
    %229 = math.exp %228 : vector<8x8xf32>
    %cst_97 = arith.constant dense<0.000000e+00> : vector<8xf32>
    %230 = vector.multi_reduction <add>, %229, %cst_97 [1] : vector<8x8xf32> to vector<8xf32>
    %231 = vector.shape_cast %230 : vector<8xf32> to vector<8x1xf32>
    %232 = tpu.reciprocal %231 {approx = true} : vector<8x1xf32> -> vector<8x1xf32>
    %233 = vector.broadcast %232 : vector<8x1xf32> to vector<8x8xf32>
    %234 = arith.mulf %229, %233 : vector<8x8xf32>
    %c6 = arith.constant 6 : index
    %c0_98 = arith.constant 0 : index
    %c0_99 = arith.constant 0 : index
    %c0_100 = arith.constant 0 : index
    %235 = vector.load %arg19[%c6, %c0_98, %c0_99, %c0_100] : memref<8x1x8x8xf32, #tpu.memory_space<vmem>>, vector<1x1x8x8xf32>
    %236 = vector.shape_cast %235 : vector<1x1x8x8xf32> to vector<8x8xf32>
    %237 = vector.shape_cast %234 : vector<8x8xf32> to vector<1x1x8x8xf32>
    tpu.vector_store %arg19[%c6, %c0_98, %c0_99, %c0_100], %237 {strides = array<i32>} : memref<8x1x8x8xf32, #tpu.memory_space<vmem>>, vector<1x1x8x8xf32>,
    %238 = arith.truncf %234 : vector<8x8xf32> to vector<8x8xbf16>
    %cst_101 = arith.constant dense<0.000000e+00> : vector<8x8xf32>
    %239 = tpu.matmul %238, %223, %cst_101 {dimension_numbers = #tpu.dot_dimension_numbers<[1], [0], [0], [1], [0, 0, 1, 1], [], []>} : vector<8x8xbf16>, vector<8x8xbf16>, vector<8x8xf32> -> vector<8x8xf32>
    %240 = arith.truncf %239 : vector<8x8xf32> to vector<8x8xbf16>
    %c0_102 = arith.constant 0 : index
    %c48 = arith.constant 48 : index
    %241 = vector.load %arg20[%c0_102, %c48] : memref<8x64xbf16, #tpu.memory_space<vmem>>, vector<8x8xbf16>
    tpu.vector_store %arg20[%c0_102, %c48], %240 {strides = array<i32>} : memref<8x64xbf16, #tpu.memory_space<vmem>>, vector<8x8xbf16>,
    %242 = vector.extract_strided_slice %90 {offsets = [0, 56], sizes = [8, 8], strides = [1, 1]} : vector<8x64xbf16> to vector<8x8xbf16>
    %243 = vector.extract_strided_slice %92 {offsets = [0, 56], sizes = [8, 8], strides = [1, 1]} : vector<8x64xbf16> to vector<8x8xbf16>
    %244 = vector.extract_strided_slice %94 {offsets = [0, 56], sizes = [8, 8], strides = [1, 1]} : vector<8x64xbf16> to vector<8x8xbf16>
    %cst_103 = arith.constant dense<0.000000e+00> : vector<8x8xf32>
    %245 = tpu.matmul %242, %243, %cst_103 {dimension_numbers = #tpu.dot_dimension_numbers<[1], [1], [0], [0], [0, 0, 1, 0], [], []>} : vector<8x8xbf16>, vector<8x8xbf16>, vector<8x8xf32> -> vector<8x8xf32>
    %cst_104 = arith.constant dense<0xFF800000> : vector<8xf32>
    %246 = vector.multi_reduction <maximumf>, %245, %cst_104 [1] : vector<8x8xf32> to vector<8xf32>
    %247 = vector.shape_cast %246 : vector<8xf32> to vector<8x1xf32>
    %248 = vector.broadcast %247 : vector<8x1xf32> to vector<8x8xf32>
    %249 = arith.subf %245, %248 : vector<8x8xf32>
    %250 = math.exp %249 : vector<8x8xf32>
    %cst_105 = arith.constant dense<0.000000e+00> : vector<8xf32>
    %251 = vector.multi_reduction <add>, %250, %cst_105 [1] : vector<8x8xf32> to vector<8xf32>
    %252 = vector.shape_cast %251 : vector<8xf32> to vector<8x1xf32>
    %253 = tpu.reciprocal %252 {approx = true} : vector<8x1xf32> -> vector<8x1xf32>
    %254 = vector.broadcast %253 : vector<8x1xf32> to vector<8x8xf32>
    %255 = arith.mulf %250, %254 : vector<8x8xf32>
    %c7 = arith.constant 7 : index
    %c0_106 = arith.constant 0 : index
    %c0_107 = arith.constant 0 : index
    %c0_108 = arith.constant 0 : index
    %256 = vector.load %arg19[%c7, %c0_106, %c0_107, %c0_108] : memref<8x1x8x8xf32, #tpu.memory_space<vmem>>, vector<1x1x8x8xf32>
    %257 = vector.shape_cast %256 : vector<1x1x8x8xf32> to vector<8x8xf32>
    %258 = vector.shape_cast %255 : vector<8x8xf32> to vector<1x1x8x8xf32>
    tpu.vector_store %arg19[%c7, %c0_106, %c0_107, %c0_108], %258 {strides = array<i32>} : memref<8x1x8x8xf32, #tpu.memory_space<vmem>>, vector<1x1x8x8xf32>,
    %259 = arith.truncf %255 : vector<8x8xf32> to vector<8x8xbf16>
    %cst_109 = arith.constant dense<0.000000e+00> : vector<8x8xf32>
    %260 = tpu.matmul %259, %244, %cst_109 {dimension_numbers = #tpu.dot_dimension_numbers<[1], [0], [0], [1], [0, 0, 1, 1], [], []>} : vector<8x8xbf16>, vector<8x8xbf16>, vector<8x8xf32> -> vector<8x8xf32>
    %261 = arith.truncf %260 : vector<8x8xf32> to vector<8x8xbf16>
    %c0_110 = arith.constant 0 : index
    %c56 = arith.constant 56 : index
    %262 = vector.load %arg20[%c0_110, %c56] : memref<8x64xbf16, #tpu.memory_space<vmem>>, vector<8x8xbf16>
    tpu.vector_store %arg20[%c0_110, %c56], %261 {strides = array<i32>} : memref<8x64xbf16, #tpu.memory_space<vmem>>, vector<8x8xbf16>,
    %c0_111 = arith.constant 0 : index
    %c0_112 = arith.constant 0 : index
    %263 = vector.load %arg20[%c0_111, %c0_112] : memref<8x64xbf16, #tpu.memory_space<vmem>>, vector<8x64xbf16>
    %cst_113 = arith.constant dense<0.000000e+00> : vector<8x32xf32>
    %264 = tpu.matmul %263, %82, %cst_113 {dimension_numbers = #tpu.dot_dimension_numbers<[1], [0], [0], [1], [0, 0, 1, 1], [], []>} : vector<8x64xbf16>, vector<64x32xbf16>, vector<8x32xf32> -> vector<8x32xf32>
    %265 = vector.broadcast %83 : vector<1x32xf32> to vector<8x32xf32>
    %266 = arith.addf %264, %265 : vector<8x32xf32>
    %267 = arith.addf %266, %79 : vector<8x32xf32>
    %cst_114 = arith.constant dense<0.000000e+00> : vector<8xf32>
    %268 = vector.multi_reduction <add>, %267, %cst_114 [1] : vector<8x32xf32> to vector<8xf32>
    %269 = vector.shape_cast %268 : vector<8xf32> to vector<8x1xf32>
    %cst_115 = arith.constant 3.200000e+01 : f32
    %270 = vector.broadcast %cst_115 : f32 to vector<8x1xf32>
    %271 = arith.divf %269, %270 : vector<8x1xf32>
    %272 = vector.broadcast %271 : vector<8x1xf32> to vector<8x32xf32>
    %273 = arith.subf %267, %272 : vector<8x32xf32>
    %274 = arith.mulf %273, %273 : vector<8x32xf32>
    %cst_116 = arith.constant dense<0.000000e+00> : vector<8xf32>
    %275 = vector.multi_reduction <add>, %274, %cst_116 [1] : vector<8x32xf32> to vector<8xf32>
    %276 = vector.shape_cast %275 : vector<8xf32> to vector<8x1xf32>
    %cst_117 = arith.constant 3.200000e+01 : f32
    %277 = vector.broadcast %cst_117 : f32 to vector<8x1xf32>
    %278 = arith.divf %276, %277 : vector<8x1xf32>
    %279 = vector.broadcast %271 : vector<8x1xf32> to vector<8x32xf32>
    %280 = arith.subf %267, %279 : vector<8x32xf32>
    %cst_118 = arith.constant 9.99999974E-6 : f32
    %281 = vector.broadcast %cst_118 : f32 to vector<8x1xf32>
    %282 = arith.addf %278, %281 : vector<8x1xf32>
    %283 = math.rsqrt %282 : vector<8x1xf32>
    %284 = vector.broadcast %283 : vector<8x1xf32> to vector<8x32xf32>
    %285 = arith.mulf %280, %284 : vector<8x32xf32>
    %286 = vector.broadcast %84 : vector<1x32xf32> to vector<8x32xf32>
    %287 = arith.mulf %285, %286 : vector<8x32xf32>
    %288 = vector.broadcast %85 : vector<1x32xf32> to vector<8x32xf32>
    %289 = arith.addf %287, %288 : vector<8x32xf32>
    %290 = arith.truncf %289 : vector<8x32xf32> to vector<8x32xbf16>
    %c0_119 = arith.constant 0 : index
    %c0_120 = arith.constant 0 : index
    %291 = vector.load %arg12[%c0_119, %c0_120] : memref<32x64xbf16, #tpu.memory_space<vmem>>, vector<32x64xbf16>
    %cst_121 = arith.constant dense<0.000000e+00> : vector<8x64xf32>
    %292 = tpu.matmul %290, %291, %cst_121 {dimension_numbers = #tpu.dot_dimension_numbers<[1], [0], [0], [1], [0, 0, 1, 1], [], []>} : vector<8x32xbf16>, vector<32x64xbf16>, vector<8x64xf32> -> vector<8x64xf32>
    %c0_122 = arith.constant 0 : index
    %c0_123 = arith.constant 0 : index
    %293 = vector.load %arg13[%c0_122, %c0_123] : memref<1x64xf32, #tpu.memory_space<vmem>>, vector<1x64xf32>
    %294 = vector.broadcast %293 : vector<1x64xf32> to vector<8x64xf32>
    %295 = arith.addf %292, %294 : vector<8x64xf32>
    %cst_124 = arith.constant 0.000000e+00 : f32
    %296 = vector.broadcast %cst_124 : f32 to vector<8x64xf32>
    %297 = arith.maximumf %295, %296 : vector<8x64xf32>
    %298 = arith.truncf %297 : vector<8x64xf32> to vector<8x64xbf16>
    %c0_125 = arith.constant 0 : index
    %c0_126 = arith.constant 0 : index
    %299 = vector.load %arg14[%c0_125, %c0_126] : memref<64x32xbf16, #tpu.memory_space<vmem>>, vector<64x32xbf16>
    %cst_127 = arith.constant dense<0.000000e+00> : vector<8x32xf32>
    %300 = tpu.matmul %298, %299, %cst_127 {dimension_numbers = #tpu.dot_dimension_numbers<[1], [0], [0], [1], [0, 0, 1, 1], [], []>} : vector<8x64xbf16>, vector<64x32xbf16>, vector<8x32xf32> -> vector<8x32xf32>
    %c0_128 = arith.constant 0 : index
    %c0_129 = arith.constant 0 : index
    %301 = vector.load %arg15[%c0_128, %c0_129] : memref<1x32xf32, #tpu.memory_space<vmem>>, vector<1x32xf32>
    %302 = vector.broadcast %301 : vector<1x32xf32> to vector<8x32xf32>
    %303 = arith.addf %300, %302 : vector<8x32xf32>
    %304 = arith.addf %303, %289 : vector<8x32xf32>
    %c0_130 = arith.constant 0 : index
    %c0_131 = arith.constant 0 : index
    %305 = vector.load %arg16[%c0_130, %c0_131] : memref<1x32xf32, #tpu.memory_space<vmem>>, vector<1x32xf32>
    %c0_132 = arith.constant 0 : index
    %c0_133 = arith.constant 0 : index
    %306 = vector.load %arg17[%c0_132, %c0_133] : memref<1x32xf32, #tpu.memory_space<vmem>>, vector<1x32xf32>
    %cst_134 = arith.constant dense<0.000000e+00> : vector<8xf32>
    %307 = vector.multi_reduction <add>, %304, %cst_134 [1] : vector<8x32xf32> to vector<8xf32>
    %308 = vector.shape_cast %307 : vector<8xf32> to vector<8x1xf32>
    %cst_135 = arith.constant 3.200000e+01 : f32
    %309 = vector.broadcast %cst_135 : f32 to vector<8x1xf32>
    %310 = arith.divf %308, %309 : vector<8x1xf32>
    %311 = vector.broadcast %310 : vector<8x1xf32> to vector<8x32xf32>
    %312 = arith.subf %304, %311 : vector<8x32xf32>
    %313 = arith.mulf %312, %312 : vector<8x32xf32>
    %cst_136 = arith.constant dense<0.000000e+00> : vector<8xf32>
    %314 = vector.multi_reduction <add>, %313, %cst_136 [1] : vector<8x32xf32> to vector<8xf32>
    %315 = vector.shape_cast %314 : vector<8xf32> to vector<8x1xf32>
    %cst_137 = arith.constant 3.200000e+01 : f32
    %316 = vector.broadcast %cst_137 : f32 to vector<8x1xf32>
    %317 = arith.divf %315, %316 : vector<8x1xf32>
    %318 = vector.broadcast %310 : vector<8x1xf32> to vector<8x32xf32>
    %319 = arith.subf %304, %318 : vector<8x32xf32>
    %cst_138 = arith.constant 9.99999974E-6 : f32
    %320 = vector.broadcast %cst_138 : f32 to vector<8x1xf32>
    %321 = arith.addf %317, %320 : vector<8x1xf32>
    %322 = math.rsqrt %321 : vector<8x1xf32>
    %323 = vector.broadcast %322 : vector<8x1xf32> to vector<8x32xf32>
    %324 = arith.mulf %319, %323 : vector<8x32xf32>
    %325 = vector.broadcast %305 : vector<1x32xf32> to vector<8x32xf32>
    %326 = arith.mulf %324, %325 : vector<8x32xf32>
    %327 = vector.broadcast %306 : vector<1x32xf32> to vector<8x32xf32>
    %328 = arith.addf %326, %327 : vector<8x32xf32>
    %c0_139 = arith.constant 0 : index
    %c0_140 = arith.constant 0 : index
    %c0_141 = arith.constant 0 : index
    %329 = vector.load %arg18[%c0_139, %c0_140, %c0_141] : memref<1x8x32xf32, #tpu.memory_space<vmem>>, vector<1x8x32xf32>
    %330 = vector.shape_cast %329 : vector<1x8x32xf32> to vector<8x32xf32>
    %331 = vector.shape_cast %328 : vector<8x32xf32> to vector<1x8x32xf32>
    tpu.vector_store %arg18[%c0_139, %c0_140, %c0_141], %331 {strides = array<i32>} : memref<1x8x32xf32, #tpu.memory_space<vmem>>, vector<1x8x32xf32>,
    return
  }
  func.func @transform_0(%arg0: i32) -> (i32, i32, i32) {
    %c0_i32 = arith.constant 0 : i32
    %c0_i32_0 = arith.constant 0 : i32
    %c0_i32_1 = arith.constant 0 : i32
    return %arg0, %c0_i32, %c0_i32_0 : i32, i32, i32
  }
  func.func @transform_1(%arg0: i32) -> (i32, i32) {
    %c0_i32 = arith.constant 0 : i32
    %c0_i32_0 = arith.constant 0 : i32
    %c0_i32_1 = arith.constant 0 : i32
    return %c0_i32, %c0_i32_0 : i32, i32
  }
  func.func @transform_2(%arg0: i32) -> (i32, i32) {
    %c0_i32 = arith.constant 0 : i32
    %c0_i32_0 = arith.constant 0 : i32
    %c0_i32_1 = arith.constant 0 : i32
    return %c0_i32, %c0_i32_0 : i32, i32
  }
  func.func @transform_3(%arg0: i32) -> (i32, i32) {
    %c0_i32 = arith.constant 0 : i32
    %c0_i32_0 = arith.constant 0 : i32
    %c0_i32_1 = arith.constant 0 : i32
    return %c0_i32, %c0_i32_0 : i32, i32
  }
  func.func @transform_4(%arg0: i32) -> (i32, i32) {
    %c0_i32 = arith.constant 0 : i32
    %c0_i32_0 = arith.constant 0 : i32
    %c0_i32_1 = arith.constant 0 : i32
    return %c0_i32, %c0_i32_0 : i32, i32
  }
  func.func @transform_5(%arg0: i32) -> (i32, i32) {
    %c0_i32 = arith.constant 0 : i32
    %c0_i32_0 = arith.constant 0 : i32
    %c0_i32_1 = arith.constant 0 : i32
    return %c0_i32, %c0_i32_0 : i32, i32
  }
  func.func @transform_6(%arg0: i32) -> (i32, i32) {
    %c0_i32 = arith.constant 0 : i32
    %c0_i32_0 = arith.constant 0 : i32
    %c0_i32_1 = arith.constant 0 : i32
    return %c0_i32, %c0_i32_0 : i32, i32
  }
  func.func @transform_7(%arg0: i32) -> (i32, i32) {
    %c0_i32 = arith.constant 0 : i32
    %c0_i32_0 = arith.constant 0 : i32
    %c0_i32_1 = arith.constant 0 : i32
    return %c0_i32, %c0_i32_0 : i32, i32
  }
  func.func @transform_8(%arg0: i32) -> (i32, i32) {
    %c0_i32 = arith.constant 0 : i32
    %c0_i32_0 = arith.constant 0 : i32
    %c0_i32_1 = arith.constant 0 : i32
    return %c0_i32, %c0_i32_0 : i32, i32
  }
  func.func @transform_9(%arg0: i32) -> (i32, i32) {
    %c0_i32 = arith.constant 0 : i32
    %c0_i32_0 = arith.constant 0 : i32
    %c0_i32_1 = arith.constant 0 : i32
    return %c0_i32, %c0_i32_0 : i32, i32
  }
  func.func @transform_10(%arg0: i32) -> (i32, i32) {
    %c0_i32 = arith.constant 0 : i32
    %c0_i32_0 = arith.constant 0 : i32
    %c0_i32_1 = arith.constant 0 : i32
    return %c0_i32, %c0_i32_0 : i32, i32
  }
  func.func @transform_11(%arg0: i32) -> (i32, i32) {
    %c0_i32 = arith.constant 0 : i32
    %c0_i32_0 = arith.constant 0 : i32
    %c0_i32_1 = arith.constant 0 : i32
    return %c0_i32, %c0_i32_0 : i32, i32
  }
  func.func @transform_12(%arg0: i32) -> (i32, i32) {
    %c0_i32 = arith.constant 0 : i32
    %c0_i32_0 = arith.constant 0 : i32
    %c0_i32_1 = arith.constant 0 : i32
    return %c0_i32, %c0_i32_0 : i32, i32
  }
  func.func @transform_13(%arg0: i32) -> (i32, i32) {
    %c0_i32 = arith.constant 0 : i32
    %c0_i32_0 = arith.constant 0 : i32
    %c0_i32_1 = arith.constant 0 : i32
    return %c0_i32, %c0_i32_0 : i32, i32
  }
  func.func @transform_14(%arg0: i32) -> (i32, i32) {
    %c0_i32 = arith.constant 0 : i32
    %c0_i32_0 = arith.constant 0 : i32
    %c0_i32_1 = arith.constant 0 : i32
    return %c0_i32, %c0_i32_0 : i32, i32
  }
  func.func @transform_15(%arg0: i32) -> (i32, i32) {
    %c0_i32 = arith.constant 0 : i32
    %c0_i32_0 = arith.constant 0 : i32
    %c0_i32_1 = arith.constant 0 : i32
    return %c0_i32, %c0_i32_0 : i32, i32
  }
  func.func @transform_16(%arg0: i32) -> (i32, i32) {
    %c0_i32 = arith.constant 0 : i32
    %c0_i32_0 = arith.constant 0 : i32
    %c0_i32_1 = arith.constant 0 : i32
    return %c0_i32, %c0_i32_0 : i32, i32
  }
  func.func @transform_17(%arg0: i32) -> (i32, i32, i32) {
    %c0_i32 = arith.constant 0 : i32
    %c0_i32_0 = arith.constant 0 : i32
    %c0_i32_1 = arith.constant 0 : i32
    return %arg0, %c0_i32, %c0_i32_0 : i32, i32, i32
  }
  func.func @transform_18(%arg0: i32) -> (i32, i32, i32, i32) {
    %c0_i32 = arith.constant 0 : i32
    %c0_i32_0 = arith.constant 0 : i32
    %c0_i32_1 = arith.constant 0 : i32
    %c0_i32_2 = arith.constant 0 : i32
    return %c0_i32, %arg0, %c0_i32_0, %c0_i32_1 : i32, i32, i32, i32
  }
}

</mosaic_0001>

<bundles_post_ra>
// kernel: forward.1
= control target key start
LH: loop header
LB: loop body
LE: loop exit
PB: predicated region body
PF: predicated region fallthrough
CT: control target
= control target key end

     0   :  { %s3601_s0 = inlined_call_operand.vmem [shape: f32[2,8,32], index: 0, kind: input, shape index: {}]   ;;  %s3602_s1 = inlined_call_operand.vmem [shape: bf16[32,192], index: 1, kind: input, shape index: {}]   ;;  %s3603_s2 = inlined_call_operand.vmem [shape: bf16[64,32], index: 2, kind: input, shape index: {}]   ;;  %s3604_s3 = inlined_call_operand.vmem [shape: f32[1,32], index: 3, kind: input, shape index: {}]   ;;  %s3605_s4 = inlined_call_operand.vmem [shape: f32[1,32], index: 4, kind: input, shape index: {}]   ;;  %s3606_s5 = inlined_call_operand.vmem [shape: f32[1,32], index: 5, kind: input, shape index: {}]   ;;  %s3607_s6 = inlined_call_operand.vmem [shape: bf16[32,192], index: 6, kind: input, shape index: {}]   ;;  %s3608_s7 = inlined_call_operand.vmem [shape: bf16[64,32], index: 7, kind: input, shape index: {}]   ;;  %s3609_s8 = inlined_call_operand.vmem [shape: f32[1,32], index: 8, kind: input, shape index: {}]   ;;  %s3610_s9 = inlined_call_operand.vmem [shape: f32[1,32], index: 9, kind: input, shape index: {}]   ;;  %s3611_s10 = inlined_call_operand.vmem [shape: f32[1,32], index: 10, kind: input, shape index: {}]   ;;  %s3612_s11 = inlined_call_operand.vmem [shape: bf16[32,64], index: 11, kind: input, shape index: {}]   ;;  %s3613_s12 = inlined_call_operand.vmem [shape: f32[1,64], index: 12, kind: input, shape index: {}]   ;;  %s3614_s13 = inlined_call_operand.vmem [shape: bf16[64,32], index: 13, kind: input, shape index: {}]   ;;  %s3615_s14 = inlined_call_operand.vmem [shape: f32[1,32], index: 14, kind: input, shape index: {}]   ;;  %s3616_s15 = inlined_call_operand.vmem [shape: f32[1,32], index: 15, kind: input, shape index: {}]   ;;  %s3617_s16 = inlined_call_operand.vmem [shape: f32[1,32], index: 16, kind: input, shape index: {}]   ;;  %s3618_s17 = inlined_call_operand.hbm [shape: f32[2,8,32], index: 17, kind: output, shape index: {0}]   ;;  %s3619_s18 = inlined_call_operand.hbm [shape: f32[8,2,8,8], index: 18, kind: output, shape index: {1}]  }
   0x1   :  { %3640 = sst [smem:[#allocation14_spill]] %s3601_s0 }
   0x2   :  { %3641 = sst [smem:[#allocation15_spill]] %s3602_s1 }
   0x3   :  { %3642 = sst [smem:[#allocation16_spill]] %s3603_s2 }
   0x4   :  { %3643 = sst [smem:[#allocation17_spill]] %s3604_s3 }
   0x5   :  { %3644 = sst [smem:[#allocation18_spill]] %s3605_s4 }
   0x6   :  { %3645 = sst [smem:[#allocation19_spill]] %s3606_s5 }
   0x7   :  { %3646 = sst [smem:[#allocation20_spill]] %s3607_s6 }
   0x8   :  { %3647 = sst [smem:[#allocation21_spill]] %s3608_s7 }
   0x9   :  { %24 = vsyncpa [#allocation4], 0 }
   0xa   :  { %26 = vsyncpa [#allocation4 + $0x1], 0 }
   0xb   :  { %27 = vsyncpa [#allocation6], 0 }
   0xc   :  { %29 = vsyncpa [#allocation6 + $0x1], 0  ;;  %s3120_s27 = smov 0   ;;  %s3122_s28 = smov 0  }
   0xd   :  { %s3124_s29 = smov 0   ;;  %s3126_s30 = smov 0  }
   0xe LB: > { %3648 = sst [smem:[#allocation9_spill]] %s2989_s27  ;;  %s3141_s0 = sadd.s32 4294967295, %s3001_s30   ;;  %s3001_s30 = sphi %s3126_s30, %s3677_s30   ;;  %s2997_s29 = sphi %s3124_s29, %s3679_s29   ;;  %s2993_s28 = sphi %s3122_s28, %s3681_s28   ;;  %s2989_s27 = sphi %s3120_s27, %s3680_s27  }
   0xf   : > { %3649 = sst [smem:[#allocation10_spill]] %s2997_s29  ;;  %s2459_s19 = sadd.s32 4294967294, %s3001_s30  }
  0x10   : > { %s3145_s1 = sadd.s32 1, %s3001_s30   ;;  %s404_s20 = sadd.s32 1, %s2997_s29 }
  0x11   : > { %3650 = sst [smem:[#allocation11_spill]] %s3145_s1  ;;  %s401_s21 = ssub.s32 %s3001_s30, %s3145_s1 }
  0x12   : > { %p414_p0 = scmp.ne.s32.totalorder %s2997_s29, %s2993_s28  ;;  %p402_p1 = scmp.eq.s32.totalorder %s401_s21, 0 }
  0x13   : > { %p415_p2 = scmp.eq.s32.totalorder %s3141_s0, 1  ;;  %p420_p3 = scmp.ne.s32.totalorder %s2993_s28, %s2989_s27 }
  0x14   : > { %p421_p4 = scmp.eq.s32.totalorder %s2459_s19, 1  ;;  %p2462_p7 = scmp.ge.s32.totalorder %s3001_s30, 1 }
  0x15   : > { %s3156_s22 = scalar_select %p402_p1, %s2997_s29, %s404_s20  }
  0x16   : > { %p3158_p5 = por %p415_p2, %p414_p0  ;;  %p3162_p6 = por %p421_p4, %p420_p3 }
  0x17   : > { %3651 = sst [smem:[#allocation12_spill]] %s3156_s22  ;;  %p520_p8 = scmp.lt.s32.totalorder %s3001_s30, 3 }
  0x18   : > { %s3653_s23 = scalar_select %p3162_p6, 1, 0 }
  0x19   : > { %p521_p9 = pnand %p2462_p7, %p520_p8 }
  0x1a   : > { %3654 = sst [smem:[#allocation13_spill]] %s3653_s23  ;;  %p578_p10 = scmp.lt.s32.totalorder (!%p521_p9), %s3141_s0, 1 }
  0x1b   : > { %524 = sbr.rel (%p521_p9) target bundleno = 4160 (0x1040), region = 88  ;;  %s3655_s26 = sld [smem:[#allocation15_spill]] (!%p521_p9) }
  0x1c   : > { %s3656_s19 = sld [smem:[#allocation14_spill]] (!%p521_p9)  ;;  %s3006_s27 = smov (!%p521_p9), 64  }
  0x1d   : > { %s3627_s29 = smov (!%p521_p9), 96   ;;  %s3629_s1 = smov (!%p521_p9), 32  }
  0x1e   : > { %s3657_s21 = sld [smem:[#allocation16_spill]] (!%p521_p9)  ;;  %s3632_s22 = smov (!%p521_p9), 48  }
  0x1f   : > { %s3658_s3 = sld [smem:[#allocation17_spill]] (!%p521_p9)  ;;  %s3633_s23 = smov (!%p521_p9), 40  }
  0x20   : > { %v3003_v2 = vmov 0   ;;  %s579_s24 = scalar_select %p578_p10, %s3141_s0, 1  ;;  %vm620_vm0 = vcmask 261120   ;;  %v3004_v7 = vmov 0.0   ;;  %vm3005_vm1 = vmmov 0  }
  0x21   : > { %v2839_v0 = vld [vmem:[%s3655_s26 + $0x14] ss:$8 sps:$4 sm:$0xff]   ;;  %v2841_v1 = vld [vmem:[%s3655_s26 + $0x10] ss:$8 sps:$4 sm:$0xff]   ;;  %656 = vmatprep.mubr.bf16.mxu0 %v3003_v2  ;;  %v2842_v3 = vld [vmem:[%s3655_s26 + $0x4] ss:$8 sps:$4 sm:$0xff]   ;;  %2611 = vmatprep.subr.bf16.mxu1 %v3004_v7 }
  0x22   : > { %636 = vmatprep.subr.bf16.mxu0 %v2839_v0  ;;  %v2844_v4 = vld [vmem:[%s3655_s26] ss:$8 sps:$4 sm:$0xff]   ;;  %s2465_s25 = sshll.u32 %s579_s24, 3  ;;  %2613 = vmatprep.mubr.msk.bf16.mxu1 %vm3005_vm1, %v3004_v7  ;;  %vm734_vm2 = vcmask 1043456   ;;  %vm718_vm3 = vcmask 64512   ;;  %vm779_vm4 = vcmask 257024  }
  0x23   : > { %637 = vmatpush1.bf16.msra.mxu0 %v2841_v1  ;;  %s581_s20 = scalar_lea.vmem %s3656_s19, %s2465_s25  ;;  %vm900_vm5 = vcmask 519424   ;;  %vm933_vm6 = vcmask 523264   ;;  %s3659_s6 = sld [smem:[#allocation20_spill]]  ;;  %vm1199_vm7 = vcmask 60416   ;;  %vm1322_vm8 = vcmask 126016  }
  0x24   : > { %638 = vmatprep.subr.bf16.mxu0 %v2842_v3  ;;  %v3186_v5 = vld [vmem:[%s581_s20] sm:$0xff]  ;;  %v2845_v52 = vld [vmem:[%s3657_s21 + $0x18] sm:$0xff]   ;;  %v2846_v53 = vld [vmem:[%s3657_s21 + $0x10] sm:$0xff]   ;;  %s3660_s4 = sld [smem:[#allocation18_spill]]  ;;  %s3635_s24 = smov 112   ;;  %vm1443_vm9 = vcmask 191616  }
  0x25   : > { %v584_v6 = vpack.c.bf16 %v3186_v5, %v3186_v5  ;;  %v2847_v54 = vld [vmem:[%s3657_s21 + $0x8] sm:$0xff]   ;;  %v2848_v56 = vld [vmem:[%s3657_s21] sm:$0xff]   ;;  %s3661_s5 = sld [smem:[#allocation19_spill]]  ;;  %s3014_s25 = smov 104   ;;  %vm1564_vm10 = vcmask 257216   ;;  %vm1685_vm11 = vcmask 322816  }
  0x26   : > { %s3636_s19 = smov 24   ;;  %s3663_s20 = smov 96   ;;  %vm1806_vm12 = vcmask 388416   ;;  %vm1927_vm13 = vcmask 454016   ;;  %vm2048_vm14 = vcmask 519616  }
  0x27   : > { %639 = vmatpush1.bf16.msra.mxu0 %v2844_v4  ;;  %v2476_v4 = vld [vmem:[%s3658_s3] ss:$0 sm:$0xff]  ;;  %s3668_s7 = sld [smem:[#allocation21_spill]] }
  0x28   : > { %2617 = vmatprep.subr.bf16.mxu0 %v3004_v7 }
  0x2a   : > { %2470 = vmatmul.mubr.msk.bf16.vlgmr.msra.gmra.mxu0 %vm620_vm0, %v584_v6 }
  0x2b   : > { %2619 = vmatprep.mubr.msk.bf16.mxu0 %vm3005_vm1, %v3004_v7 }
  0xea   : > { %v658_v8 = vpop.f32.mrf.mxu0 }
  0xeb   : > { %v665_v9 = vmul.f32 0.17677669, %v658_v8  ;;  %v667_v10 = vpack.c.bf16 %v658_v8, %v658_v8 }
  0xec   : > { %v660_v11 = vpop.f32.mrf.mxu0 }
  0xed   : > { %v668_v12 = vpack.c.bf16 %v660_v11, %v660_v11  ;;  %670 = vrot.lane.b32.xlu0 %v667_v10, %s3006_s27  ;;  %v666_v13 = vpack.c.bf16 %v665_v9, %v665_v9 }
  0xee   : > { %v662_v14 = vpop.f32.mrf.mxu0 }
  0xef   : > { %v736_v15 = vsel %vm734_vm2, %v668_v12, 0  ;;  %782 = vrot.lane.b32.xlu1 %v666_v13, %s3627_s29 }
  0xf0   : > { %v663_v16 = vpop.f32.mrf.mxu0  ;;  %2618 = vmatpush3.bf16.msra.mxu0 %v736_v15 }
  0xf1   : > { %784 = vrot.lane.b32.xlu0 %v667_v10, %s3629_s1  ;;  %2629 = vmatprep.subr.bf16.mxu0 %v3004_v7 }
 0x15f   : > { %v671_v17 = vpop.permute.xlu0 %670 }
 0x160   : > { %v676_v18 = vsel %vm620_vm0, %v671_v17, 0 }
 0x161   : > { %2612 = vmatpush3.bf16.xpose.msra.mxu1 %v676_v18  ;;  %v783_v21 = vpop.permute.xlu1 %782 }
 0x162   : > { %2623 = vmatprep.subr.bf16.mxu1 %v3004_v7 }
 0x163   : > { %v785_v19 = vpop.permute.xlu0 %784 }
 0x164   : > { %v790_v20 = vsel %vm620_vm0, %v785_v19, 0  ;;  %v2851_v19 = vld [vmem:[%s3659_s6 + $0x14] ss:$8 sps:$4 sm:$0xff]  }
 0x168   : > { %2614 = vmatmul.mubr.msk.bf16.vlgmr.msra.gmra.mxu1 %vm620_vm0, %v666_v13 }
 0x169   : > { %2624 = vmatpush3.bf16.xpose.msra.mxu1 %v790_v20  ;;  %2625 = vmatprep.mubr.msk.bf16.mxu1 %vm3005_vm1, %v3004_v7  ;;  %v2854_v20 = vld [vmem:[%s3659_s6 + $0x4] ss:$8 sps:$4 sm:$0xff]  }
 0x16a   : > { %2635 = vmatprep.subr.bf16.mxu1 %v3004_v7 }
 0x170   : > { %2626 = vmatmul.mubr.msk.bf16.vlgmr.msra.gmra.mxu1 %vm620_vm0, %v783_v21  ;;  %v2852_v21 = vld [vmem:[%s3659_s6] ss:$8 sps:$4 sm:$0xff]  }
 0x171   : > { %2643 = vmatprep.mubr.msk.bf16.mxu1 %vm3005_vm1, %v3004_v7  ;;  %2636 = vmatpush3.bf16.msra.mxu1 %v2845_v52 }
 0x172   : > { %2637 = vmatprep.subr.bf16.mxu1 %v3004_v7 }
 0x175   : > { %2638 = vmatpush3.bf16.msra.mxu1 %v2846_v53 }
 0x176   : > { %2639 = vmatprep.subr.bf16.mxu1 %v3004_v7 }
 0x179   : > { %2640 = vmatpush3.bf16.msra.mxu1 %v2847_v54 }
 0x17a   : > { %2641 = vmatprep.subr.bf16.mxu1 %v3004_v7 }
 0x17d   : > { %2642 = vmatpush3.bf16.msra.mxu1 %v2848_v56 }
 0x17e   : > { %2653 = vmatprep.subr.bf16.mxu1 %v3004_v7 }
 0x228   : > { %v712_v22 = vpop.f32.mrf.mxu1 }
 0x229   : > { %v719_v23 = vsel %vm718_vm3, %v712_v22, -inf }
 0x22a   : > { %720 = vmax.xlane.f32.xlu1 %v719_v23  ;;  %v2615_v24 = vpop.f32.mrf.mxu1 }
 0x22c   : > { %v715_v25 = vpop.f32.mrf.mxu1 }
 0x22e   : > { %v2616_v26 = vpop.f32.mrf.mxu1 }
 0x22f   : > { %v2482_v26 = vld [vmem:[%s3660_s4] ss:$0 sm:$0xff] }
 0x230   : > { %v826_v27 = vpop.f32.mrf.mxu1 }
 0x231   : > { %v832_v28 = vsel %vm718_vm3, %v826_v27, -inf }
 0x232   : > { %833 = vmax.xlane.f32.xlu0 %v832_v28  ;;  %v2627_v29 = vpop.f32.mrf.mxu1  ;;  %v2483_v28 = vld [vmem:[%s3661_s5] ss:$0 sm:$0xff] }
 0x234   : > { %v829_v30 = vpop.f32.mrf.mxu1 }
 0x236   : > { %v2628_v31 = vpop.f32.mrf.mxu1 }
 0x2b3   : > { %v721_v32 = vpop.xlane.xlu1 %720 }
 0x2b4   : > { %v722_v33 = vsub.f32 %v712_v22, %v721_v32 }
 0x2b6   : > { %v723_v34 = vmul.f32 1.442695, %v722_v33 }
 0x2b8   : > { %2865 = vpow2.f32 %v723_v34 }
 0x2bb   : > { %v834_v35 = vpop.xlane.xlu0 %833 }
 0x2bc   : > { %v835_v36 = vsub.f32 %v826_v27, %v834_v35 }
 0x2be   : > { %v836_v37 = vmul.f32 1.442695, %v835_v36 }
 0x2c0   : > { %2867 = vpow2.f32 %v836_v37 }
 0x2c5   : > { %v2866_v38 = vpop.eup %2865 }
 0x2c6   : > { %v725_v39 = vsel %vm718_vm3, %v2866_v38, 0.0 }
 0x2c7   : > { %726 = vadd.xlane.f32.xlu0 %v725_v39 }
 0x2cd   : > { %v2868_v40 = vpop.eup %2867 }
 0x2ce   : > { %v838_v41 = vsel %vm718_vm3, %v2868_v40, 0.0 }
 0x2cf   : > { %839 = vadd.xlane.f32.xlu1 %v838_v41 }
 0x2dd   : > { %845 = vrot.lane.b32.xlu0 %v668_v12, %s3627_s29  ;;  %s3634_s29 = smov 120  }
 0x350   : > { %v727_v42 = vpop.xlane.xlu0 %726 }
 0x351   : > { %2869 = vrcp.f32 %v727_v42 }
 0x354   : > { %v846_v46 = vpop.permute.xlu0 %845 }
 0x355   : > { %v851_v48 = vsel %vm734_vm2, %v846_v46, 0 }
 0x358   : > { %v840_v43 = vpop.xlane.xlu1 %839 }
 0x359   : > { %2871 = vrcp.f32 %v840_v43 }
 0x35e   : > { %v2870_v44 = vpop.eup %2869 }
 0x35f   : > { %v729_v45 = vmul.f32 %v2870_v44, %v2866_v38 }
 0x361   : > { %v730_v47 = vpack.c.bf16 %v729_v45, %v729_v45 }
 0x363   : > { %2620 = vmatmul.mubr.msk.bf16.vlgmr.msra.gmra.mxu0 %vm718_vm3, %v730_v47 }
 0x364   : > { %2630 = vmatpush3.bf16.msra.mxu0 %v851_v48  ;;  %2631 = vmatprep.mubr.msk.bf16.mxu0 %vm3005_vm1, %v3004_v7 }
 0x365   : > { %1057 = vmatprep.subr.bf16.mxu0 %v2851_v19 }
 0x366   : > { %v2872_v49 = vpop.eup %2871 }
 0x367   : > { %v842_v50 = vmul.f32 %v2872_v49, %v2868_v40 }
 0x369   : > { %v843_v51 = vpack.c.bf16 %v842_v50, %v842_v50 }
 0x36b   : > { %2632 = vmatmul.mubr.msk.bf16.vlgmr.msra.gmra.mxu0 %vm718_vm3, %v843_v51 }
 0x36c   : > { %1077 = vmatprep.mubr.bf16.mxu0 %v3003_v2 }
 0x423   : > { %v772_v55 = vpop.f32.mrf.mxu0 }
 0x424   : > { %v778_v57 = vpack.c.bf16 %v772_v55, %v772_v55 }
 0x425   : > { %v2621_v58 = vpop.f32.mrf.mxu0 }
 0x426   : > { %780 = vst.msk [vmem:[#allocation2] sm:$0xf] %vm779_vm4, %v778_v57 }
 0x427   : > { %v775_v59 = vpop.f32.mrf.mxu0 }
 0x429   : > { %v2622_v60 = vpop.f32.mrf.mxu0 }
 0x42b   : > { %v887_v61 = vpop.f32.mrf.mxu0 }
 0x42c   : > { %v2545_v62 = vpack.c.bf16 %v887_v61, %v887_v61 }
 0x42d   : > { %v2633_v63 = vpop.f32.mrf.mxu0 }
 0x42e   : > { %897 = vrot.lane.b32.xlu1 %v2545_v62, %s3629_s1  ;;  %s3631_s1 = smov 56  }
 0x42f   : > { %v890_v0 = vpop.f32.mrf.mxu0 }
 0x431   : > { %v2634_v1 = vpop.f32.mrf.mxu0 }
 0x4a0   : > { %v898_v2 = vpop.permute.xlu1 %897 }
 0x4a1   : > { %901 = vst.msk [vmem:[#allocation2] sm:$0xf] %vm900_vm5, %v898_v2 }
 0x4a8   : > { %v902_v3 = vld [vmem:[#allocation2] sm:$0xf] }
 0x4a9   : > { %2644 = vmatmul.mubr.msk.bf16.vlgmr.msra.gmra.mxu1 %vm933_vm6, %v902_v3 }
 0x4aa   : > { %2655 = vmatprep.mubr.msk.bf16.mxu1 %vm3005_vm1, %v3004_v7 }
 0x569   : > { %v971_v6 = vpop.f32.mrf.mxu1 }
 0x56a   : > { %v972_v8 = vadd.f32 %v2476_v4, %v971_v6 }
 0x56b   : > { %v2645_v9 = vpop.f32.mrf.mxu1 }
 0x56c   : > { %v977_v10 = vadd.f32 %v972_v8, %v3186_v5  ;;  %v2849_v5 = vld [vmem:[%s3659_s6 + $0x10] ss:$8 sps:$4 sm:$0xff]  }
 0x56d   : > { %v974_v11 = vpop.f32.mrf.mxu1  ;;  %1058 = vmatpush1.bf16.msra.mxu0 %v2849_v5 }
 0x56e   : > { %v978_v12 = vsel %vm620_vm0, %v977_v10, 0.0  ;;  %1059 = vmatprep.subr.bf16.mxu0 %v2854_v20 }
 0x56f   : > { %979 = vadd.xlane.f32.xlu1 %v978_v12  ;;  %v2646_v13 = vpop.f32.mrf.mxu1 }
 0x571   : > { %1060 = vmatpush1.bf16.msra.mxu0 %v2852_v21 }
 0x572   : > { %2647 = vmatprep.subr.bf16.mxu0 %v3004_v7 }
 0x5f8   : > { %v980_v14 = vpop.xlane.xlu1 %979 }
 0x5f9   : > { %v982_v15 = vmul.f32 0.03125, %v980_v14 }
 0x5fb   : > { %v983_v16 = vsub.f32 %v977_v10, %v982_v15 }
 0x5fd   : > { %v984_v17 = vmul.f32 %v983_v16, %v983_v16 }
 0x5ff   : > { %v985_v18 = vsel %vm620_vm0, %v984_v17, 0.0 }
 0x600   : > { %986 = vadd.xlane.f32.xlu0 %v985_v18 }
 0x689   : > { %v987_v22 = vpop.xlane.xlu0 %986 }
 0x68a   : > { %v988_v23 = vmul.f32 0.03125, %v987_v22 }
 0x68c   : > { %v989_v24 = vadd.f32 1e-05, %v988_v23 }
 0x68e   : > { %2873 = vrsqrt.f32 %v989_v24 }
 0x69b   : > { %v2874_v25 = vpop.eup %2873 }
 0x69c   : > { %v991_v27 = vmul.f32 %v2874_v25, %v983_v16 }
 0x69e   : > { %v998_v29 = vmul.f32 %v2482_v26, %v991_v27 }
 0x6a0   : > { %v3268_v30 = vadd.f32 %v2483_v28, %v998_v29 }
 0x6a2   : > { %v1006_v31 = vpack.c.bf16 %v3268_v30, %v3268_v30 }
 0x6a4   : > { %2488 = vmatmul.mubr.msk.bf16.vlgmr.msra.gmra.mxu0 %vm620_vm0, %v1006_v31 }
 0x6a5   : > { %2649 = vmatprep.mubr.msk.bf16.mxu0 %vm3005_vm1, %v3004_v7 }
 0x764   : > { %v1079_v32 = vpop.f32.mrf.mxu0 }
 0x765   : > { %v1086_v33 = vmul.f32 0.35355338, %v1079_v32  ;;  %v1088_v34 = vpack.c.bf16 %v1079_v32, %v1079_v32 }
 0x766   : > { %v1081_v35 = vpop.f32.mrf.mxu0 }
 0x767   : > { %v3275_v36 = vpack.c.bf16 %v1081_v35, %v1081_v35  ;;  %1204 = vrot.lane.b32.xlu1 %v1088_v34, %s3631_s1  ;;  %1091 = vrot.lane.b32.xlu0 %v1088_v34, %s3006_s27  ;;  %v1087_v38 = vpack.c.bf16 %v1086_v33, %v1086_v33  ;;  %s3662_s27 = smov 32   ;;  %s3637_s1 = smov 16  }
 0x768   : > { %v1083_v37 = vpop.f32.mrf.mxu0 }
 0x769   : > { %v1156_v39 = vsel %vm734_vm2, %v3275_v36, 0 }
 0x76a   : > { %v1084_v40 = vpop.f32.mrf.mxu0  ;;  %2654 = vmatpush3.bf16.msra.mxu1 %v1156_v39 }
 0x76b   : > { %1326 = vrot.lane.b32.xlu0 %v1088_v34, %s3632_s22  ;;  %1202 = vrot.lane.b32.xlu1 %v1087_v38, %s3634_s29  ;;  %s3017_s22 = smov 88   ;;  %s3019_s29 = smov 80  }
 0x76c   : > { %2665 = vmatprep.subr.bf16.mxu1 %v3004_v7 }
 0x76f   : > { %1447 = vrot.lane.b32.xlu0 %v1088_v34, %s3633_s23  ;;  %1324 = vrot.lane.b32.xlu1 %v1087_v38, %s3635_s24  ;;  %s3638_s23 = smov 8   ;;  %s3020_s24 = smov 72  }
 0x773   : > { %1568 = vrot.lane.b32.xlu0 %v1088_v34, %s3662_s27  ;;  %1445 = vrot.lane.b32.xlu1 %v1087_v38, %s3014_s25 }
 0x777   : > { %1689 = vrot.lane.b32.xlu0 %v1088_v34, %s3636_s19  ;;  %1566 = vrot.lane.b32.xlu1 %v1087_v38, %s3663_s20  ;;  %s3664_s19 = smov 112  }
 0x77b   : > { %1810 = vrot.lane.b32.xlu0 %v1088_v34, %s3637_s1  ;;  %1687 = vrot.lane.b32.xlu1 %v1087_v38, %s3017_s22  ;;  %s3665_s1 = smov 120  }
 0x77f   : > { %1931 = vrot.lane.b32.xlu0 %v1088_v34, %s3638_s23  ;;  %1808 = vrot.lane.b32.xlu1 %v1087_v38, %s3019_s29 }
 0x783   : > { %1929 = vrot.lane.b32.xlu1 %v1087_v38, %s3020_s24 }
 0x7d9   : > { %v1092_v41 = vpop.permute.xlu0 %1091  ;;  %v1205_v43 = vpop.permute.xlu1 %1204 }
 0x7da   : > { %v1097_v42 = vsel %vm718_vm3, %v1092_v41, 0  ;;  %v1210_v44 = vsel %vm718_vm3, %v1205_v43, 0 }
 0x7db   : > { %2648 = vmatpush3.bf16.xpose.msra.mxu0 %v1097_v42 }
 0x7dc   : > { %2659 = vmatprep.subr.bf16.mxu0 %v3004_v7 }
 0x7dd   : > { %v1327_v45 = vpop.permute.xlu0 %1326  ;;  %v1203_v46 = vpop.permute.xlu1 %1202 }
 0x7de   : > { %v1332_v47 = vsel %vm718_vm3, %v1327_v45, 0 }
 0x7e1   : > { %v1448_v48 = vpop.permute.xlu0 %1447  ;;  %v1325_v49 = vpop.permute.xlu1 %1324 }
 0x7e2   : > { %2650 = vmatmul.mubr.msk.bf16.vlgmr.msra.gmra.mxu0 %vm718_vm3, %v1087_v38  ;;  %v1453_v50 = vsel %vm718_vm3, %v1448_v48, 0 }
 0x7e3   : > { %2660 = vmatpush3.bf16.xpose.msra.mxu0 %v1210_v44  ;;  %2661 = vmatprep.mubr.msk.bf16.mxu0 %vm3005_vm1, %v3004_v7 }
 0x7e4   : > { %2671 = vmatprep.subr.bf16.mxu0 %v3004_v7 }
 0x7e5   : > { %v1569_v51 = vpop.permute.xlu0 %1568  ;;  %v1446_v52 = vpop.permute.xlu1 %1445 }
 0x7e6   : > { %v1574_v53 = vsel %vm718_vm3, %v1569_v51, 0 }
 0x7e9   : > { %v1690_v54 = vpop.permute.xlu0 %1689  ;;  %v1567_v55 = vpop.permute.xlu1 %1566 }
 0x7ea   : > { %2662 = vmatmul.mubr.msk.bf16.vlgmr.msra.gmra.mxu0 %vm718_vm3, %v1203_v46  ;;  %v1695_v56 = vsel %vm718_vm3, %v1690_v54, 0 }
 0x7eb   : > { %2672 = vmatpush3.bf16.xpose.msra.mxu0 %v1332_v47  ;;  %2673 = vmatprep.mubr.msk.bf16.mxu0 %vm3005_vm1, %v3004_v7 }
 0x7ec   : > { %2683 = vmatprep.subr.bf16.mxu0 %v3004_v7 }
 0x7ed   : > { %v1811_v57 = vpop.permute.xlu0 %1810  ;;  %v1688_v58 = vpop.permute.xlu1 %1687 }
 0x7ee   : > { %v1816_v59 = vsel %vm718_vm3, %v1811_v57, 0 }
 0x7f1   : > { %v1932_v60 = vpop.permute.xlu0 %1931  ;;  %v1809_v61 = vpop.permute.xlu1 %1808 }
 0x7f2   : > { %2674 = vmatmul.mubr.msk.bf16.vlgmr.msra.gmra.mxu0 %vm718_vm3, %v1325_v49  ;;  %v1937_v62 = vsel %vm718_vm3, %v1932_v60, 0 }
 0x7f3   : > { %2684 = vmatpush3.bf16.xpose.msra.mxu0 %v1453_v50  ;;  %2685 = vmatprep.mubr.msk.bf16.mxu0 %vm3005_vm1, %v3004_v7 }
 0x7f4   : > { %2695 = vmatprep.subr.bf16.mxu0 %v3004_v7 }
 0x7f5   : > { %v1930_v63 = vpop.permute.xlu1 %1929 }
 0x7fa   : > { %2686 = vmatmul.mubr.msk.bf16.vlgmr.msra.gmra.mxu0 %vm718_vm3, %v1446_v52 }
 0x7fb   : > { %2696 = vmatpush3.bf16.xpose.msra.mxu0 %v1574_v53  ;;  %2697 = vmatprep.mubr.msk.bf16.mxu0 %vm3005_vm1, %v3004_v7 }
 0x7fc   : > { %2707 = vmatprep.subr.bf16.mxu0 %v3004_v7 }
 0x802   : > { %2698 = vmatmul.mubr.msk.bf16.vlgmr.msra.gmra.mxu0 %vm718_vm3, %v1567_v55 }
 0x803   : > { %2708 = vmatpush3.bf16.xpose.msra.mxu0 %v1695_v56  ;;  %2709 = vmatprep.mubr.msk.bf16.mxu0 %vm3005_vm1, %v3004_v7 }
 0x804   : > { %2719 = vmatprep.subr.bf16.mxu0 %v3004_v7 }
 0x80a   : > { %2710 = vmatmul.mubr.msk.bf16.vlgmr.msra.gmra.mxu0 %vm718_vm3, %v1688_v58 }
 0x80b   : > { %2720 = vmatpush3.bf16.xpose.msra.mxu0 %v1816_v59  ;;  %2721 = vmatprep.mubr.msk.bf16.mxu0 %vm3005_vm1, %v3004_v7 }
 0x80c   : > { %2731 = vmatprep.subr.bf16.mxu0 %v3004_v7 }
 0x812   : > { %2722 = vmatmul.mubr.msk.bf16.vlgmr.msra.gmra.mxu0 %vm718_vm3, %v1809_v61 }
 0x813   : > { %2732 = vmatpush3.bf16.xpose.msra.mxu0 %v1937_v62  ;;  %2733 = vmatprep.mubr.msk.bf16.mxu0 %vm3005_vm1, %v3004_v7 }
 0x814   : > { %2743 = vmatprep.subr.bf16.mxu0 %v3004_v7 }
 0x81a   : > { %2734 = vmatmul.mubr.msk.bf16.vlgmr.msra.gmra.mxu0 %vm718_vm3, %v1930_v63 }
 0x81b   : > { %2751 = vmatprep.mubr.msk.bf16.mxu0 %vm3005_vm1, %v3004_v7 }
 0x8a2   : > { %v1133_v0 = vpop.f32.mrf.mxu0 }
 0x8a3   : > { %v1139_v1 = vsel %vm718_vm3, %v1133_v0, -inf }
 0x8a4   : > { %1140 = vmax.xlane.f32.xlu0 %v1139_v1  ;;  %v2651_v2 = vpop.f32.mrf.mxu0 }
 0x8a6   : > { %v1136_v3 = vpop.f32.mrf.mxu0 }
 0x8a8   : > { %v2652_v4 = vpop.f32.mrf.mxu0 }
 0x8aa   : > { %v1246_v6 = vpop.f32.mrf.mxu0 }
 0x8ab   : > { %v1252_v8 = vsel %vm718_vm3, %v1246_v6, -inf }
 0x8ac   : > { %1253 = vmax.xlane.f32.xlu1 %v1252_v8  ;;  %v2663_v9 = vpop.f32.mrf.mxu0 }
 0x8ae   : > { %v1249_v10 = vpop.f32.mrf.mxu0 }
 0x8b0   : > { %v2664_v11 = vpop.f32.mrf.mxu0 }
 0x8b2   : > { %v1368_v12 = vpop.f32.mrf.mxu0 }
 0x8b3   : > { %v1374_v13 = vsel %vm718_vm3, %v1368_v12, -inf }
 0x8b4   : > { %1375 = vmax.xlane.f32.xlu0 %v1374_v13  ;;  %v2675_v14 = vpop.f32.mrf.mxu0 }
 0x8b6   : > { %v1371_v15 = vpop.f32.mrf.mxu0 }
 0x8b8   : > { %v2676_v16 = vpop.f32.mrf.mxu0 }
 0x8ba   : > { %v1489_v17 = vpop.f32.mrf.mxu0 }
 0x8bb   : > { %v1495_v18 = vsel %vm718_vm3, %v1489_v17, -inf }
 0x8bc   : > { %1496 = vmax.xlane.f32.xlu0 %v1495_v18  ;;  %v2687_v19 = vpop.f32.mrf.mxu0 }
 0x8be   : > { %v1492_v5 = vpop.f32.mrf.mxu0 }
 0x8c0   : > { %v2688_v20 = vpop.f32.mrf.mxu0 }
 0x8c2   : > { %v1610_v21 = vpop.f32.mrf.mxu0 }
 0x8c3   : > { %v1616_v22 = vsel %vm718_vm3, %v1610_v21, -inf }
 0x8c4   : > { %1617 = vmax.xlane.f32.xlu1 %v1616_v22  ;;  %v2699_v23 = vpop.f32.mrf.mxu0 }
 0x8c6   : > { %v1613_v24 = vpop.f32.mrf.mxu0 }
 0x8c8   : > { %v2700_v25 = vpop.f32.mrf.mxu0 }
 0x8ca   : > { %v1731_v26 = vpop.f32.mrf.mxu0 }
 0x8cb   : > { %v1737_v27 = vsel %vm718_vm3, %v1731_v26, -inf }
 0x8cc   : > { %1738 = vmax.xlane.f32.xlu0 %v1737_v27  ;;  %v2711_v28 = vpop.f32.mrf.mxu0 }
 0x8ce   : > { %v1734_v29 = vpop.f32.mrf.mxu0 }
 0x8d0   : > { %v2712_v31 = vpop.f32.mrf.mxu0 }
 0x8d2   : > { %v1852_v32 = vpop.f32.mrf.mxu0 }
 0x8d3   : > { %v1858_v33 = vsel %vm718_vm3, %v1852_v32, -inf }
 0x8d4   : > { %1859 = vmax.xlane.f32.xlu1 %v1858_v33  ;;  %v2723_v34 = vpop.f32.mrf.mxu0 }
 0x8d6   : > { %v1855_v35 = vpop.f32.mrf.mxu0 }
 0x8d8   : > { %v2724_v37 = vpop.f32.mrf.mxu0 }
 0x8da   : > { %v1973_v38 = vpop.f32.mrf.mxu0 }
 0x8db   : > { %v1979_v39 = vsel %vm718_vm3, %v1973_v38, -inf }
 0x8dc   : > { %1980 = vmax.xlane.f32.xlu0 %v1979_v39  ;;  %v2735_v40 = vpop.f32.mrf.mxu0 }
 0x8de   : > { %v1976_v41 = vpop.f32.mrf.mxu0 }
 0x8e0   : > { %v2736_v42 = vpop.f32.mrf.mxu0 }
 0x8e5   : > { %1388 = vrot.lane.b32.xlu1 %v3275_v36, %s3664_s19 }
 0x8f2   : > { %1267 = vrot.lane.b32.xlu0 %v3275_v36, %s3665_s1  ;;  %s3387_s1 = sand.u32 1, %s2993_s28  }
 0x92d   : > { %v1141_v43 = vpop.xlane.xlu0 %1140 }
 0x92e   : > { %v1142_v44 = vsub.f32 %v1133_v0, %v1141_v43 }
 0x930   : > { %v1143_v45 = vmul.f32 1.442695, %v1142_v44 }
 0x932   : > { %2875 = vpow2.f32 %v1143_v45 }
 0x935   : > { %v1254_v46 = vpop.xlane.xlu1 %1253 }
 0x936   : > { %v1255_v47 = vsub.f32 %v1246_v6, %v1254_v46 }
 0x938   : > { %v1256_v48 = vmul.f32 1.442695, %v1255_v47 }
 0x93a   : > { %2877 = vpow2.f32 %v1256_v48 }
 0x93d   : > { %v1376_v49 = vpop.xlane.xlu0 %1375 }
 0x93e   : > { %v1377_v50 = vsub.f32 %v1368_v12, %v1376_v49 }
 0x93f   : > { %v2876_v51 = vpop.eup %2875 }
 0x940   : > { %v1378_v52 = vmul.f32 1.442695, %v1377_v50  ;;  %v1145_v53 = vsel %vm718_vm3, %v2876_v51, 0.0 }
 0x941   : > { %1146 = vadd.xlane.f32.xlu1 %v1145_v53 }
 0x942   : > { %2879 = vpow2.f32 %v1378_v52 }
 0x945   : > { %v1497_v54 = vpop.xlane.xlu0 %1496 }
 0x946   : > { %v1498_v55 = vsub.f32 %v1489_v17, %v1497_v54 }
 0x947   : > { %v3348_v56 = vpop.eup %2877 }
 0x948   : > { %v1499_v57 = vmul.f32 1.442695, %v1498_v55  ;;  %v1258_v58 = vsel %vm718_vm3, %v3348_v56, 0.0 }
 0x949   : > { %1259 = vadd.xlane.f32.xlu0 %v1258_v58 }
 0x94a   : > { %2881 = vpow2.f32 %v1499_v57 }
 0x94d   : > { %v1618_v63 = vpop.xlane.xlu1 %1617 }
 0x94e   : > { %v1619_v0 = vsub.f32 %v1610_v21, %v1618_v63 }
 0x94f   : > { %v3352_v59 = vpop.eup %2879 }
 0x950   : > { %v1380_v60 = vsel %vm718_vm3, %v3352_v59, 0.0  ;;  %v1620_v2 = vmul.f32 1.442695, %v1619_v0 }
 0x951   : > { %1381 = vadd.xlane.f32.xlu1 %v1380_v60 }
 0x952   : > { %2883 = vpow2.f32 %v1620_v2 }
 0x955   : > { %v1739_v1 = vpop.xlane.xlu0 %1738 }
 0x956   : > { %v1740_v3 = vsub.f32 %v1731_v26, %v1739_v1 }
 0x957   : > { %v3356_v61 = vpop.eup %2881 }
 0x958   : > { %v1501_v62 = vsel %vm718_vm3, %v3356_v61, 0.0  ;;  %v1741_v9 = vmul.f32 1.442695, %v1740_v3 }
 0x959   : > { %1502 = vadd.xlane.f32.xlu0 %v1501_v62 }
 0x95a   : > { %2885 = vpow2.f32 %v1741_v9 }
 0x95d   : > { %v1860_v4 = vpop.xlane.xlu1 %1859 }
 0x95e   : > { %v1861_v8 = vsub.f32 %v1852_v32, %v1860_v4 }
 0x95f   : > { %v3364_v13 = vpop.eup %2883 }
 0x960   : > { %v1862_v11 = vmul.f32 1.442695, %v1861_v8  ;;  %v1622_v14 = vsel %vm718_vm3, %v3364_v13, 0.0 }
 0x961   : > { %v1389_v20 = vpop.permute.xlu1 %1388 }
 0x962   : > { %1509 = vrot.lane.b32.xlu1 %v3275_v36, %s3014_s25  ;;  %2887 = vpow2.f32 %v1862_v11  ;;  %s2464_s25 = sshll.u32 %s3387_s1, 6  ;;  %v1394_v33 = vsel %vm734_vm2, %v1389_v20, 0 }
 0x965   : > { %v1981_v6 = vpop.xlane.xlu0 %1980 }
 0x966   : > { %v1982_v10 = vsub.f32 %v1973_v38, %v1981_v6 }
 0x967   : > { %v3368_v15 = vpop.eup %2885 }
 0x968   : > { %v1983_v12 = vmul.f32 1.442695, %v1982_v10  ;;  %v1743_v17 = vsel %vm718_vm3, %v3368_v15, 0.0 }
 0x969   : > { %v1268_v22 = vpop.permute.xlu0 %1267 }
 0x96a   : > { %2889 = vpow2.f32 %v1983_v12 }
 0x96f   : > { %1630 = vrot.lane.b32.xlu0 %v3275_v36, %s3663_s20  ;;  %v3370_v16 = vpop.eup %2887 }
 0x970   : > { %v1864_v19 = vsel %vm718_vm3, %v3370_v16, 0.0 }
 0x977   : > { %v3374_v18 = vpop.eup %2889 }
 0x978   : > { %v1985_v5 = vsel %vm718_vm3, %v3374_v18, 0.0 }
 0x986   : > { %1623 = vadd.xlane.f32.xlu1 %v1622_v14 }
 0x98a   : > { %1744 = vadd.xlane.f32.xlu1 %v1743_v17 }
 0x98e   : > { %1865 = vadd.xlane.f32.xlu0 %v1864_v19  ;;  %1986 = vadd.xlane.f32.xlu1 %v1985_v5 }
 0x99f   : > { %1751 = vrot.lane.b32.xlu1 %v3275_v36, %s3017_s22  ;;  %s3390_s22 = scalar_lea.vmem [#allocation5], %s2464_s25 }
 0x9a0   : > { %s2365_s3 = sshll.u32 %s3390_s22, 4  ;;  %s3532_s3 = int_to_ptr.vmem [resolvable:$true] %s2365_s3 }
 0x9a4   : > { %1872 = vrot.lane.b32.xlu0 %v3275_v36, %s3019_s29  ;;  %s3666_s29 = smov 16  }
 0x9a8   : > { %1993 = vrot.lane.b32.xlu0 %v3275_v36, %s3020_s24  ;;  %v1273_v36 = vsel %vm734_vm2, %v1268_v22, 0  ;;  %s3667_s24 = smov 24  }
 0x9ca   : > { %v1147_v21 = vpop.xlane.xlu1 %1146 }
 0x9cb   : > { %2891 = vrcp.f32 %v1147_v21 }
 0x9d2   : > { %v1260_v23 = vpop.xlane.xlu0 %1259 }
 0x9d3   : > { %2893 = vrcp.f32 %v1260_v23 }
 0x9d8   : > { %v2892_v24 = vpop.eup %2891 }
 0x9d9   : > { %v1149_v25 = vmul.f32 %v2892_v24, %v2876_v51 }
 0x9da   : > { %v1382_v26 = vpop.xlane.xlu1 %1381 }
 0x9db   : > { %2895 = vrcp.f32 %v1382_v26  ;;  %v1151_v27 = vpack.c.bf16 %v1149_v25, %v1149_v25  ;;  %1150 = vst.msk [vmem:[%s3390_s22] sm:$0xff] %vm718_vm3, %v1149_v25 }
 0x9dd   : > { %2656 = vmatmul.mubr.msk.bf16.vlgmr.msra.gmra.mxu1 %vm718_vm3, %v1151_v27 }
 0x9de   : > { %2666 = vmatpush3.bf16.msra.mxu1 %v1273_v36  ;;  %2667 = vmatprep.mubr.msk.bf16.mxu1 %vm3005_vm1, %v3004_v7  ;;  %v1510_v37 = vpop.permute.xlu1 %1509 }
 0x9df   : > { %2677 = vmatprep.subr.bf16.mxu1 %v3004_v7  ;;  %v1515_v39 = vsel %vm734_vm2, %v1510_v37, 0  ;;  %v2857_v37 = vld [vmem:[%s3668_s7 + $0x8] sm:$0xff]  }
 0x9e0   : > { %v2894_v28 = vpop.eup %2893 }
 0x9e1   : > { %v1262_v29 = vmul.f32 %v2894_v28, %v3348_v56  ;;  %v2855_v28 = vld [vmem:[%s3668_s7 + $0x18] sm:$0xff]  }
 0x9e2   : > { %v1503_v31 = vpop.xlane.xlu0 %1502  ;;  %2744 = vmatpush3.bf16.msra.mxu0 %v2855_v28 }
 0x9e3   : > { %2897 = vrcp.f32 %v1503_v31  ;;  %v1265_v32 = vpack.c.bf16 %v1262_v29, %v1262_v29  ;;  %2492 = vst.msk [vmem:[%s3390_s22 + $0x8] sm:$0xff] %vm718_vm3, %v1262_v29  ;;  %v2856_v31 = vld [vmem:[%s3668_s7 + $0x10] sm:$0xff]   ;;  %2745 = vmatprep.subr.bf16.mxu0 %v3004_v7 }
 0x9e5   : > { %2668 = vmatmul.mubr.msk.bf16.vlgmr.msra.gmra.mxu1 %vm718_vm3, %v1265_v32 }
 0x9e6   : > { %2678 = vmatpush3.bf16.msra.mxu1 %v1394_v33  ;;  %2679 = vmatprep.mubr.msk.bf16.mxu1 %vm3005_vm1, %v3004_v7  ;;  %v1631_v42 = vpop.permute.xlu0 %1630 }
 0x9e7   : > { %2689 = vmatprep.subr.bf16.mxu1 %v3004_v7  ;;  %v1636_v44 = vsel %vm734_vm2, %v1631_v42, 0  ;;  %2746 = vmatpush3.bf16.msra.mxu0 %v2856_v31 }
 0x9e8   : > { %v2896_v34 = vpop.eup %2895  ;;  %2747 = vmatprep.subr.bf16.mxu0 %v3004_v7 }
 0x9e9   : > { %v1384_v35 = vmul.f32 %v2896_v34, %v3352_v59 }
 0x9eb   : > { %v1387_v38 = vpack.c.bf16 %v1384_v35, %v1384_v35  ;;  %2496 = vst.msk [vmem:[%s3390_s22 + $0x10] sm:$0xff] %vm718_vm3, %v1384_v35  ;;  %2748 = vmatpush3.bf16.msra.mxu0 %v2857_v37 }
 0x9ec   : > { %2749 = vmatprep.subr.bf16.mxu0 %v3004_v7 }
 0x9ed   : > { %2680 = vmatmul.mubr.msk.bf16.vlgmr.msra.gmra.mxu1 %vm718_vm3, %v1387_v38 }
 0x9ee   : > { %2690 = vmatpush3.bf16.msra.mxu1 %v1515_v39  ;;  %2691 = vmatprep.mubr.msk.bf16.mxu1 %vm3005_vm1, %v3004_v7  ;;  %v2858_v39 = vld [vmem:[%s3668_s7] sm:$0xff]  }
 0x9ef   : > { %2701 = vmatprep.subr.bf16.mxu1 %v3004_v7  ;;  %2750 = vmatpush3.bf16.msra.mxu0 %v2858_v39 }
 0x9f0   : > { %v2898_v40 = vpop.eup %2897 }
 0x9f1   : > { %v1505_v41 = vmul.f32 %v2898_v40, %v3356_v61 }
 0x9f3   : > { %v1508_v43 = vpack.c.bf16 %v1505_v41, %v1505_v41  ;;  %2500 = vst.msk [vmem:[%s3390_s22 + $0x18] sm:$0xff] %vm718_vm3, %v1505_v41 }
 0x9f5   : > { %2692 = vmatmul.mubr.msk.bf16.vlgmr.msra.gmra.mxu1 %vm718_vm3, %v1508_v43 }
 0x9f6   : > { %2702 = vmatpush3.bf16.msra.mxu1 %v1636_v44  ;;  %2703 = vmatprep.mubr.msk.bf16.mxu1 %vm3005_vm1, %v3004_v7 }
 0x9f7   : > { %2713 = vmatprep.subr.bf16.mxu1 %v3004_v7 }
 0xa0f   : > { %v1624_v45 = vpop.xlane.xlu1 %1623 }
 0xa10   : > { %2899 = vrcp.f32 %v1624_v45 }
 0xa13   : > { %v1745_v46 = vpop.xlane.xlu1 %1744 }
 0xa14   : > { %2901 = vrcp.f32 %v1745_v46 }
 0xa17   : > { %v1987_v47 = vpop.xlane.xlu1 %1986  ;;  %v1866_v48 = vpop.xlane.xlu0 %1865 }
 0xa18   : > { %2903 = vrcp.f32 %v1987_v47 }
 0xa19   : > { %2905 = vrcp.f32 %v1866_v48 }
 0xa1b   : > { %v1752_v51 = vpop.permute.xlu1 %1751  ;;  %v1873_v59 = vpop.permute.xlu0 %1872 }
 0xa1c   : > { %v1757_v54 = vsel %vm734_vm2, %v1752_v51, 0  ;;  %v1878_v62 = vsel %vm734_vm2, %v1873_v59, 0 }
 0xa1d   : > { %v2900_v49 = vpop.eup %2899 }
 0xa1e   : > { %v1626_v50 = vmul.f32 %v2900_v49, %v3364_v13 }
 0xa1f   : > { %v1994_v63 = vpop.permute.xlu0 %1993 }
 0xa20   : > { %v1629_v52 = vpack.c.bf16 %v1626_v50, %v1626_v50  ;;  %2504 = vst.msk [vmem:[%s3390_s22 + $0x20] sm:$0xff] %vm718_vm3, %v1626_v50  ;;  %v1999_v1 = vsel %vm734_vm2, %v1994_v63, 0 }
 0xa21   : > { %v2902_v53 = vpop.eup %2901 }
 0xa22   : > { %2704 = vmatmul.mubr.msk.bf16.vlgmr.msra.gmra.mxu1 %vm718_vm3, %v1629_v52  ;;  %v1747_v55 = vmul.f32 %v2902_v53, %v3368_v15 }
 0xa23   : > { %2714 = vmatpush3.bf16.msra.mxu1 %v1757_v54  ;;  %2715 = vmatprep.mubr.msk.bf16.mxu1 %vm3005_vm1, %v3004_v7 }
 0xa24   : > { %2725 = vmatprep.subr.bf16.mxu1 %v3004_v7  ;;  %2508 = vst.msk [vmem:[%s3390_s22 + $0x28] sm:$0xff] %vm718_vm3, %v1747_v55  ;;  %v1750_v61 = vpack.c.bf16 %v1747_v55, %v1747_v55 }
 0xa25   : > { %v2904_v56 = vpop.eup %2903 }
 0xa26   : > { %v2906_v57 = vpop.eup %2905  ;;  %v1989_v58 = vmul.f32 %v2904_v56, %v3374_v18 }
 0xa27   : > { %v1868_v60 = vmul.f32 %v2906_v57, %v3370_v16  ;;  %v2519_v57 = vld [vmem:[%s3609_s8] ss:$0 sm:$0xff] }
 0xa28   : > { %2516 = vst.msk [vmem:[%s3390_s22 + $0x38] sm:$0xff] %vm718_vm3, %v1989_v58  ;;  %v1992_v2 = vpack.c.bf16 %v1989_v58, %v1989_v58 }
 0xa29   : > { %2512 = vst.msk [vmem:[%s3390_s22 + $0x30] sm:$0xff] %vm718_vm3, %v1868_v60  ;;  %v1871_v0 = vpack.c.bf16 %v1868_v60, %v1868_v60 }
 0xa2a   : > { %2716 = vmatmul.mubr.msk.bf16.vlgmr.msra.gmra.mxu1 %vm718_vm3, %v1750_v61 }
 0xa2b   : > { %2726 = vmatpush3.bf16.msra.mxu1 %v1878_v62  ;;  %2727 = vmatprep.mubr.msk.bf16.mxu1 %vm3005_vm1, %v3004_v7 }
 0xa2c   : > { %2737 = vmatprep.subr.bf16.mxu1 %v3004_v7 }
 0xa32   : > { %2728 = vmatmul.mubr.msk.bf16.vlgmr.msra.gmra.mxu1 %vm718_vm3, %v1871_v0 }
 0xa33   : > { %2738 = vmatpush3.bf16.msra.mxu1 %v1999_v1  ;;  %2739 = vmatprep.mubr.msk.bf16.mxu1 %vm3005_vm1, %v3004_v7 }
 0xa34   : > { %2755 = vmatprep.subr.bf16.mxu1 %v3004_v7 }
 0xa3a   : > { %2740 = vmatmul.mubr.msk.bf16.vlgmr.msra.gmra.mxu1 %vm718_vm3, %v1992_v2 }
 0xa3b   : > { %2759 = vmatprep.mubr.msk.bf16.mxu1 %vm3005_vm1, %v3004_v7 }
 0xa9d   : > { %v1192_v3 = vpop.f32.mrf.mxu1 }
 0xa9e   : > { %v1198_v4 = vpack.c.bf16 %v1192_v3, %v1192_v3 }
 0xa9f   : > { %v2657_v6 = vpop.f32.mrf.mxu1 }
 0xaa0   : > { %1200 = vst.msk [vmem:[#allocation2] sm:$0xf] %vm1199_vm7, %v1198_v4 }
 0xaa1   : > { %v1195_v8 = vpop.f32.mrf.mxu1 }
 0xaa2   : > { %v2859_v8 = vld [vmem:[%s3612_s11 + $0x8] sm:$0xff]  }
 0xaa3   : > { %v2658_v9 = vpop.f32.mrf.mxu1  ;;  %2756 = vmatpush3.bf16.msra.mxu1 %v2859_v8 }
 0xaa4   : > { %2757 = vmatprep.subr.bf16.mxu1 %v3004_v7 }
 0xaa5   : > { %v1309_v10 = vpop.f32.mrf.mxu1 }
 0xaa6   : > { %v2546_v11 = vpack.c.bf16 %v1309_v10, %v1309_v10 }
 0xaa7   : > { %v2669_v12 = vpop.f32.mrf.mxu1 }
 0xaa8   : > { %1319 = vrot.lane.b32.xlu1 %v2546_v11, %s3638_s23 }
 0xaa9   : > { %v1312_v13 = vpop.f32.mrf.mxu1 }
 0xaaa   : > { %v2525_v13 = vld [vmem:[%s3610_s9] ss:$0 sm:$0xff] }
 0xaab   : > { %v2670_v14 = vpop.f32.mrf.mxu1 }
 0xaad   : > { %v1430_v15 = vpop.f32.mrf.mxu1 }
 0xaae   : > { %v2547_v16 = vpack.c.bf16 %v1430_v15, %v1430_v15  ;;  %v2526_v15 = vld [vmem:[%s3611_s10] ss:$0 sm:$0xff] }
 0xaaf   : > { %v2681_v17 = vpop.f32.mrf.mxu1 }
 0xab0   : > { %1440 = vrot.lane.b32.xlu0 %v2547_v16, %s3666_s29  ;;  %s3670_s29 = smov 48  }
 0xab1   : > { %v1433_v18 = vpop.f32.mrf.mxu1 }
 0xab2   : > { %v2861_v18 = vld [vmem:[%s3614_s13 + $0x18] sm:$0xff]  }
 0xab3   : > { %v2682_v19 = vpop.f32.mrf.mxu1 }
 0xab5   : > { %v1551_v5 = vpop.f32.mrf.mxu1 }
 0xab6   : > { %v2548_v20 = vpack.c.bf16 %v1551_v5, %v1551_v5  ;;  %v2862_v5 = vld [vmem:[%s3614_s13 + $0x10] sm:$0xff]  }
 0xab7   : > { %v2693_v21 = vpop.f32.mrf.mxu1 }
 0xab8   : > { %1561 = vrot.lane.b32.xlu1 %v2548_v20, %s3667_s24  ;;  %s3669_s24 = smov 40   ;;  %v2863_v20 = vld [vmem:[%s3614_s13 + $0x8] sm:$0xff]   ;;  %v2864_v21 = vld [vmem:[%s3614_s13] sm:$0xff]  }
 0xab9   : > { %v1554_v22 = vpop.f32.mrf.mxu1 }
 0xaba   : > { %v2527_v22 = vld [vmem:[%s3613_s12] ss:$0 sm:$0xff] }
 0xabb   : > { %v2694_v23 = vpop.f32.mrf.mxu1 }
 0xae2   : > { %v1672_v24 = vpop.f32.mrf.mxu1 }
 0xae3   : > { %v2549_v25 = vpack.c.bf16 %v1672_v24, %v1672_v24 }
 0xae4   : > { %v2705_v26 = vpop.f32.mrf.mxu1 }
 0xae5   : > { %1682 = vrot.lane.b32.xlu0 %v2549_v25, %s3662_s27  ;;  %s3639_s27 = sshll.u32 %s3141_s0, 7 }
 0xae6   : > { %v1675_v27 = vpop.f32.mrf.mxu1  ;;  %s3529_s25 = scalar_lea.hbm %s3619_s18, %s3639_s27 }
 0xae8   : > { %v2706_v36 = vpop.f32.mrf.mxu1 }
 0xaea   : > { %v1793_v29 = vpop.f32.mrf.mxu1 }
 0xaeb   : > { %v2550_v32 = vpack.c.bf16 %v1793_v29, %v1793_v29 }
 0xaec   : > { %v2717_v33 = vpop.f32.mrf.mxu1 }
 0xaed   : > { %1803 = vrot.lane.b32.xlu1 %v2550_v32, %s3669_s24  ;;  %s3671_s24 = smov 56  }
 0xaee   : > { %v1796_v34 = vpop.f32.mrf.mxu1 }
 0xaf0   : > { %v2718_v35 = vpop.f32.mrf.mxu1 }
 0xaf2   : > { %v1914_v38 = vpop.f32.mrf.mxu1 }
 0xaf3   : > { %v2551_v40 = vpack.c.bf16 %v1914_v38, %v1914_v38 }
 0xaf4   : > { %v2729_v41 = vpop.f32.mrf.mxu1 }
 0xaf5   : > { %1924 = vrot.lane.b32.xlu0 %v2551_v40, %s3670_s29  ;;  %s2911_s29 = scalar_lea.vmem %s3532_s3, 1024 }
 0xaf6   : > { %v1917_v42 = vpop.f32.mrf.mxu1  ;;  %p2912_p11 = scmp.ne.s32.totalorder %s3532_s3, %s2911_s29 }
 0xaf8   : > { %v2730_v43 = vpop.f32.mrf.mxu1  ;;  %p2913_p12 = pnand %p2912_p11, %p3158_p5 }
 0xafa   : > { %v2035_v44 = vpop.f32.mrf.mxu1  ;;  %p2914_p13 = pneg %p2913_p12 }
 0xafb   : > { %v2552_v45 = vpack.c.bf16 %v2035_v44, %v2035_v44 }
 0xafc   : > { %v2741_v46 = vpop.f32.mrf.mxu1 }
 0xafd   : > { %2045 = vrot.lane.b32.xlu1 %v2552_v45, %s3671_s24  ;;  %s3021_s24 = smov [#allocation5]  }
 0xafe   : > { %v2038_v47 = vpop.f32.mrf.mxu1  ;;  %s2915_s4 = sshll.u32 %s3021_s24, 4  ;;  %s2916_s4 = int_to_ptr.vmem [resolvable:$false] %s2915_s4 }
 0xaff   : > { %s2917_s5 = scalar_lea.vmem %s2916_s4, 2048  ;;  %p2918_p0 = scmp.lt.s32.totalorder %s3532_s3, %s2916_s4 }
 0xb00   : > { %v2742_v48 = vpop.f32.mrf.mxu1  ;;  %p2919_p1 = scmp.lt.s32.totalorder %s2917_s5, %s2911_s29 }
 0xb02   : > { %p2920_p2 = por %p2919_p1, %p2918_p0 }
 0xb04   : > { %p2921_p3 = pnand %p2920_p2, %p2914_p13 }
 0xb1a   : > { %v1320_v49 = vpop.permute.xlu1 %1319 }
 0xb1b   : > { %1323 = vst.msk [vmem:[#allocation2] sm:$0xf] %vm1322_vm8, %v1320_v49 }
 0xb22   : > { %v1441_v50 = vpop.permute.xlu0 %1440 }
 0xb23   : > { %1444 = vst.msk [vmem:[#allocation2] sm:$0xf] %vm1443_vm9, %v1441_v50 }
 0xb2a   : > { %v1562_v51 = vpop.permute.xlu1 %1561 }
 0xb2b   : > { %1565 = vst.msk [vmem:[#allocation2] sm:$0xf] %vm1564_vm10, %v1562_v51 }
 0xb57   : > { %v1683_v52 = vpop.permute.xlu0 %1682 }
 0xb58   : > { %1686 = vst.msk [vmem:[#allocation2] sm:$0xf] %vm1685_vm11, %v1683_v52 }
 0xb5f   : > { %v1804_v53 = vpop.permute.xlu1 %1803 }
 0xb60   : > { %1807 = vst.msk [vmem:[#allocation2] sm:$0xf] %vm1806_vm12, %v1804_v53 }
 0xb67   : > { %v1925_v54 = vpop.permute.xlu0 %1924 }
 0xb68   : > { %1928 = vst.msk [vmem:[#allocation2] sm:$0xf] %vm1927_vm13, %v1925_v54 }
 0xb6f   : > { %v2046_v55 = vpop.permute.xlu1 %2045 }
 0xb70   : > { %2049 = vst.msk [vmem:[#allocation2] sm:$0xf] %vm2048_vm14, %v2046_v55 }
 0xb77   : > { %v2050_v56 = vld [vmem:[#allocation2] sm:$0xf] }
 0xb78   : > { %2752 = vmatmul.mubr.msk.bf16.vlgmr.msra.gmra.mxu0 %vm933_vm6, %v2050_v56 }
 0xc38   : > { %v2118_v58 = vpop.f32.mrf.mxu0 }
 0xc39   : > { %v2119_v59 = vadd.f32 %v2519_v57, %v2118_v58 }
 0xc3a   : > { %v2753_v60 = vpop.f32.mrf.mxu0 }
 0xc3b   : > { %v2124_v61 = vadd.f32 %v2119_v59, %v3268_v30  ;;  %v2860_v30 = vld [vmem:[%s3612_s11] sm:$0xff]  }
 0xc3c   : > { %v2121_v62 = vpop.f32.mrf.mxu0  ;;  %2758 = vmatpush3.bf16.msra.mxu1 %v2860_v30 }
 0xc3d   : > { %v2125_v63 = vsel %vm620_vm0, %v2124_v61, 0.0  ;;  %2763 = vmatprep.subr.bf16.mxu1 %v3004_v7 }
 0xc3e   : > { %2126 = vadd.xlane.f32.xlu0 %v2125_v63  ;;  %v2754_v0 = vpop.f32.mrf.mxu0 }
 0xcc7   : > { %v2127_v1 = vpop.xlane.xlu0 %2126 }
 0xcc8   : > { %v2128_v2 = vmul.f32 0.03125, %v2127_v1 }
 0xcca   : > { %v2129_v3 = vsub.f32 %v2124_v61, %v2128_v2 }
 0xccc   : > { %v2130_v4 = vmul.f32 %v2129_v3, %v2129_v3 }
 0xcce   : > { %v2131_v6 = vsel %vm620_vm0, %v2130_v4, 0.0 }
 0xccf   : > { %2132 = vadd.xlane.f32.xlu1 %v2131_v6 }
 0xd58   : > { %v2133_v9 = vpop.xlane.xlu1 %2132 }
 0xd59   : > { %v2134_v10 = vmul.f32 0.03125, %v2133_v9 }
 0xd5b   : > { %v2135_v11 = vadd.f32 1e-05, %v2134_v10 }
 0xd5d   : > { %2907 = vrsqrt.f32 %v2135_v11 }
 0xd6a   : > { %v2908_v12 = vpop.eup %2907 }
 0xd6b   : > { %v2137_v14 = vmul.f32 %v2908_v12, %v2129_v3 }
 0xd6d   : > { %v2144_v16 = vmul.f32 %v2525_v13, %v2137_v14 }
 0xd6f   : > { %v2151_v17 = vadd.f32 %v2526_v15, %v2144_v16 }
 0xd71   : > { %v2152_v19 = vpack.c.bf16 %v2151_v17, %v2151_v17 }
 0xd73   : > { %2760 = vmatmul.mubr.msk.bf16.vlgmr.msra.gmra.mxu1 %vm620_vm0, %v2152_v19 }
 0xd74   : > { %2764 = vmatpush3.bf16.msra.mxu1 %v2861_v18  ;;  %2771 = vmatprep.mubr.msk.bf16.mxu1 %vm3005_vm1, %v3004_v7 }
 0xd75   : > { %2765 = vmatprep.subr.bf16.mxu1 %v3004_v7 }
 0xd78   : > { %2766 = vmatpush3.bf16.msra.mxu1 %v2862_v5 }
 0xd79   : > { %2767 = vmatprep.subr.bf16.mxu1 %v3004_v7 }
 0xd7c   : > { %2768 = vmatpush3.bf16.msra.mxu1 %v2863_v20 }
 0xd7d   : > { %2769 = vmatprep.subr.bf16.mxu1 %v3004_v7  ;;  %v2531_v7 = vld [vmem:[%s3615_s14] ss:$0 sm:$0xff] }
 0xd80   : > { %2770 = vmatpush3.bf16.msra.mxu1 %v2864_v21 }
 0xe33   : > { %v2213_v23 = vpop.f32.mrf.mxu1 }
 0xe34   : > { %v2214_v24 = vadd.f32 %v2527_v22, %v2213_v23 }
 0xe35   : > { %v2761_v25 = vpop.f32.mrf.mxu1 }
 0xe36   : > { %v2219_v26 = vmax.f32 %v2214_v24, 0.0 }
 0xe37   : > { %v2216_v27 = vpop.f32.mrf.mxu1 }
 0xe38   : > { %v2220_v36 = vpack.c.bf16 %v2219_v26, %v2219_v26 }
 0xe39   : > { %v2762_v28 = vpop.f32.mrf.mxu1 }
 0xe3a   : > { %2772 = vmatmul.mubr.msk.bf16.vlgmr.msra.gmra.mxu1 %vm933_vm6, %v2220_v36 }
 0xefa   : > { %v2297_v29 = vpop.f32.mrf.mxu1 }
 0xefb   : > { %v2298_v31 = vadd.f32 %v2531_v7, %v2297_v29 }
 0xefc   : > { %v2773_v32 = vpop.f32.mrf.mxu1 }
 0xefd   : > { %v2303_v33 = vadd.f32 %v2298_v31, %v2151_v17 }
 0xefe   : > { %v2300_v34 = vpop.f32.mrf.mxu1 }
 0xeff   : > { %v2306_v35 = vsel %vm620_vm0, %v2303_v33, 0.0 }
 0xf00   : > { %2307 = vadd.xlane.f32.xlu0 %v2306_v35  ;;  %v2774_v37 = vpop.f32.mrf.mxu1 }
 0xf89   : > { %v2308_v38 = vpop.xlane.xlu0 %2307 }
 0xf8a   : > { %v2309_v39 = vmul.f32 0.03125, %v2308_v38 }
 0xf8c   : > { %v2310_v40 = vsub.f32 %v2303_v33, %v2309_v39 }
 0xf8e   : > { %v2311_v41 = vmul.f32 %v2310_v40, %v2310_v40 }
 0xf90   : > { %v2312_v42 = vsel %vm620_vm0, %v2311_v41, 0.0 }
 0xf91   : > { %2313 = vadd.xlane.f32.xlu0 %v2312_v42 }
 0xf92   : > { %2924 = shalt.err (!%p2921_p3)
}
 0xf93   : > { %s2925_s22 = scalar_lea.hbm %s3529_s25, 1024  ;;  %s2929_s24 = scalar_lea.hbm %s3619_s18, 2048 }
 0xf94   : > { %p2926_p4 = scmp.ne.s32.totalorder %s3529_s25, %s2925_s22  ;;  %p2930_p9 = scmp.lt.s32.totalorder %s3529_s25, %s3619_s18 }
 0xf95   : > { %p2931_p10 = scmp.lt.s32.totalorder %s2929_s24, %s2925_s22 }
 0xf96   : > { %p2927_p7 = pnand %p2926_p4, %p3158_p5 }
 0xf97   : > { %p2932_p11 = por %p2931_p10, %p2930_p9 }
 0xf98   : > { %p2928_p8 = pneg %p2927_p7 }
 0xf9a   : > { %p2933_p12 = pnand %p2932_p11, %p2928_p8 }
 0xf9c   : > { %2936 = shalt.err (!%p2933_p12)
}
 0xf9d   : > { %s3022_s4 = smov 128   ;;  %s3023_s5 = smov 256   ;;  %v2537_v47 = vld [vmem:[%s3616_s15] ss:$0 sm:$0xff] }
 0xf9e   : > { %s3672_s29 = smov 8   ;;  %s3673_s19 = scalar_lea.sflag [#allocation6], %s3387_s1  ;;  %v2538_v49 = vld [vmem:[%s3617_s16] ss:$0 sm:$0xff] }
 0xf9f   : > { %2776 = dma.vmem_to_hbm [thread:$0]  (%p3158_p5), %s3532_s3, 1024, %s3529_s25, %s3673_s19, %s3022_s4, %s3023_s5, %s3672_s29  }
 0xfa0   : > { %s2463_s27 = sshll.u32 %s3387_s1, 3  ;;  %s3674_s25 = sshll.u32 %s3141_s0, 7 }
 0xfa1   : > { %s570_s6 = scalar_lea.vmem [#allocation3], %s2463_s27  ;;  %s2351_s5 = scalar_lea.hbm %s3618_s17, %s3674_s25 }
 0xfa2   : > { %s2353_s7 = sshll.u32 %s570_s6, 4  ;;  %s2335_s29 = scalar_lea.sflag [#allocation4], %s3387_s1  ;;  %s2354_s7 = int_to_ptr.vmem [resolvable:$true] %s2353_s7 }
 0xfa3   : > { %s2937_s19 = scalar_lea.vmem %s2354_s7, 128  ;;  %s3024_s23 = smov [#allocation3]  }
 0xfa4   : > { %p2938_p13 = scmp.ne.s32.totalorder %s2354_s7, %s2937_s19  ;;  %s2941_s22 = sshll.u32 %s3024_s23, 4  ;;  %s2942_s22 = int_to_ptr.vmem [resolvable:$false] %s2941_s22 }
 0xfa5   : > { %s2943_s27 = scalar_lea.vmem %s2942_s22, 256  ;;  %p2944_p2 = scmp.lt.s32.totalorder %s2354_s7, %s2942_s22 }
 0xfa6   : > { %p2939_p0 = pnand %p2938_p13, %p3158_p5  ;;  %p2945_p3 = scmp.lt.s32.totalorder %s2943_s27, %s2937_s19 }
 0xfa8   : > { %p2940_p1 = pneg %p2939_p0  ;;  %p2946_p4 = por %p2945_p3, %p2944_p2 }
 0xfaa   : > { %p2947_p7 = pnand %p2946_p4, %p2940_p1 }
0x101a   : > { %v2314_v43 = vpop.xlane.xlu0 %2313 }
0x101b   : > { %v2315_v44 = vmul.f32 0.03125, %v2314_v43 }
0x101d   : > { %v2316_v45 = vadd.f32 1e-05, %v2315_v44 }
0x101f   : > { %2909 = vrsqrt.f32 %v2316_v45 }
0x102c   : > { %v2910_v46 = vpop.eup %2909 }
0x102d   : > { %v2318_v48 = vmul.f32 %v2910_v46, %v2310_v40 }
0x102f   : > { %v2325_v50 = vmul.f32 %v2537_v47, %v2318_v48 }
0x1031   : > { %v2332_v51 = vadd.f32 %v2538_v49, %v2325_v50 }
0x1033   : > { %2333 = vst.msk [vmem:[%s570_s6] sm:$0xff] %vm620_vm0, %v2332_v51 }
0x1034   : > { %2950 = shalt.err (!%p2947_p7)
}
0x1035   : > { %s2951_s0 = scalar_lea.hbm %s2351_s5, 128  ;;  %s2955_s20 = scalar_lea.hbm %s3618_s17, 256 }
0x1036   : > { %p2952_p8 = scmp.ne.s32.totalorder %s2351_s5, %s2951_s0  ;;  %p2956_p11 = scmp.lt.s32.totalorder %s2351_s5, %s3618_s17 }
0x1037   : > { %p2957_p12 = scmp.lt.s32.totalorder %s2955_s20, %s2951_s0 }
0x1038   : > { %p2953_p9 = pnand %p2952_p8, %p3158_p5 }
0x1039   : > { %p2958_p13 = por %p2957_p12, %p2956_p11 }
0x103a   : > { %p2954_p10 = pneg %p2953_p9 }
0x103c   : > { %p2959_p0 = pnand %p2958_p13, %p2954_p10 }
0x103e   : > { %2962 = shalt.err (!%p2959_p0)
}
0x103f   : > { %2775 = dma.vmem_to_hbm [thread:$0]  (%p3158_p5), %s2354_s7, 128, %s2351_s5, %s2335_s29  }
0x1040 PF: > { %s3675_s3 = sld [smem:[#allocation9_spill]]  ;;  %p2786_p1 = scmp.ge.s32.totalorder %s3001_s30, 2 }
0x1042   : > { %p2780_p2 = pnand %p2786_p1, %p3162_p6 }
0x1044   : > { %p2781_p3 = pneg %p2780_p2 }
0x1046   : > { %s2380_s19 = sand.u32 1, %s3675_s3  }
0x1047   : > { %s2381_s23 = scalar_lea.sflag [#allocation4], %s2380_s19 }
0x1048   : > { %2980 = dma.done.wait (%p2781_p3), %s2381_s23, 128  }
0x1049   : > { %2982 = vsyncadd (%p2781_p3), %s2381_s23, 4294967168  ;;  %s2390_s22 = scalar_lea.sflag [#allocation6], %s2380_s19 }
0x104a   : > { %2984 = dma.done.wait (%p2781_p3), %s2390_s22, 1024  }
0x104b   : > { %2986 = vsyncadd (%p2781_p3), %s2390_s22, 4294966272  ;;  %s3677_s30 = sld [smem:[#allocation11_spill]]  ;;  %s3680_s27 = smov %s2993_s28 }
0x104c   : > { %s3678_s0 = sld [smem:[#allocation10_spill]] }
0x104d   : > { %s3679_s29 = sld [smem:[#allocation12_spill]] }
0x1051   : > { %p32_p5 = scmp.ge.s32.totalorder %s3677_s30, 4  }
0x1052   : > { %s3681_s28 = smov %s3678_s0 }
0x1053   :  { %34 = sbr.rel (!%p32_p5) target bundleno = 14 (0xe), region = 147 }
0x1058   :  { %2395 = vsyncpa [#allocation4], 1 }
0x1059   :  { %2397 = vsyncpa [#allocation4 + $0x1], 1 }
0x105a   :  { %2398 = vsyncpa [#allocation6], 1 }
0x105b   :  { %2400 = vsyncpa [#allocation6 + $0x1], 1 }

</bundles_post_ra>
